<compile_context>
chip_gen: v7x
topology: tpu7x:2x2x1
jax: 0.10.0
libtpu: 0.0.40
codegen_flags: <defaults>
</compile_context>

<pallas_src>
import functools

import jax
import jax.numpy as jnp
from jax.experimental import pallas as pl
from jax.experimental.pallas import tpu as pltpu


def _round_up(n, m):
    return ((n + m - 1) // m) * m


def _chip_defaults():
    """(packing factor, bf16 activations) based on TPU generation."""
    try:
        kind = jax.devices()[0].device_kind.lower()
    except Exception:
        kind = ""
    if any(tag in kind for tag in ("v6", "v7", "7x", "trillium")):
        return 8, True     # 2x256x256 MXU, bf16-capable VPU/EUP
    return 4, False        # v5e / unknown: 128-wide MXU, f32 elementwise only


def _block_diag(w, P):
    """(in, out) -> (P*in, P*out) with w repeated on the block diagonal."""
    if P == 1:
        return w
    fin, fout = w.shape
    eye = jnp.eye(P, dtype=w.dtype)
    bd = eye[:, None, :, None] * w[None, :, None, :]   # (P, fin, P, fout)
    return bd.reshape(P * fin, P * fout)


def _linear(x, w_ref, b_ref):
    # Cast the activation to the weight dtype right at the MXU input (a no-op
    # when activations are already kept in that dtype); accumulate in f32 on
    # the MXU; bias add in f32 on the VPU.
    y = jnp.dot(
        x.astype(w_ref.dtype),
        w_ref[...],
        preferred_element_type=jnp.float32,
        precision=jax.lax.Precision.HIGHEST,
    )
    return y + b_ref[...]


def autoencoder_kernel(
    x_ref,
    # encoder (packed block-diagonal weights, tiled biases)
    w1_ref, b1_ref, w2_ref, b2_ref, w3_ref, b3_ref,
    # encoder_mu
    wmu_ref, bmu_ref,
    # decoder
    dw1_ref, db1_ref, dw2_ref, db2_ref, dw3_ref, db3_ref, dw4_ref, db4_ref,
    # output
    out_ref,
    *, act_dtype,
):
    x = x_ref[...]  # (bbp, P*data_dim) f32, lane-dense

    # encoder: Linear(data,4)+ReLU, Linear(4,4)+ReLU, Linear(4,16)+ReLU (xP packed)
    h = jax.nn.relu(_linear(x, w1_ref, b1_ref)).astype(act_dtype)
    h = jax.nn.relu(_linear(h, w2_ref, b2_ref)).astype(act_dtype)
    h = jax.nn.relu(_linear(h, w3_ref, b3_ref)).astype(act_dtype)

    # encoder_mu: Linear(16, latent)   (z, no activation)
    z = _linear(h, wmu_ref, bmu_ref).astype(act_dtype)

    # decoder: Linear(latent,16)+ReLU, Linear(16,4)+ReLU, Linear(4,4)+ReLU,
    #          Linear(4,data)+Sigmoid
    d = jax.nn.relu(_linear(z, dw1_ref, db1_ref)).astype(act_dtype)
    d = jax.nn.relu(_linear(d, dw2_ref, db2_ref)).astype(act_dtype)
    d = jax.nn.relu(_linear(d, dw3_ref, db3_ref)).astype(act_dtype)
    recon = jax.nn.sigmoid(_linear(d, dw4_ref, db4_ref))  # f32 sigmoid (EUP)

    # TODO(synk): emit the reconstruction in bf16 (out_shape dtype bf16) if the
    # downstream loss tolerates it - halves output HBM writeback.
    out_ref[...] = recon.astype(out_ref.dtype)


def autoencoder_forward(x, params, *, block_rows=16384, pack=None,
                        use_bf16_matmul=True, bf16_activations=None):
    """Fused autoencoder forward pass.

    x: (B, data_dim) f32.  `pack` rows are packed per lane-dense row via
    block-diagonal weight replication; `block_rows` is the (unpacked) batch
    rows per grid step.  Any B works (batch is padded to the packed tile).
    """
    B, data_dim = x.shape

    auto_pack, auto_bf16_act = _chip_defaults()
    P = int(pack) if pack is not None else auto_pack
    P = max(1, P)
    if bf16_activations is None:
        bf16_activations = auto_bf16_act
    if not use_bf16_matmul:
        bf16_activations = False   # exact f32 correctness path stays all-f32

    w_dtype = jnp.bfloat16 if use_bf16_matmul else jnp.float32
    act_dtype = jnp.bfloat16 if bf16_activations else jnp.float32

    names = [
        "w1", "b1", "w2", "b2", "w3", "b3", "wmu", "bmu",
        "dw1", "db1", "dw2", "db2", "dw3", "db3", "dw4", "db4",
    ]
    # Weights: cast once + block-diagonal pack.  Biases: lane-tile, keep f32.
    param_list = []
    for n in names:
        p = params[n]
        if n.startswith(("w", "dw")):
            param_list.append(_block_diag(p.astype(w_dtype), P))
        else:
            param_list.append(jnp.tile(p, (1, P)))

    # ---- batch tiling over packed rows ----------------------------------
    rows = pl.cdiv(B, P)                                   # packed rows of data
    bbp_pref = max(8, _round_up(block_rows // P, 8))       # big tiles (perf)
    bbp_two = max(8, _round_up(pl.cdiv(rows, 2), 8))       # >=2 grid steps (v7x)
    bbp = min(bbp_pref, bbp_two)
    rows_pad = _round_up(rows, bbp)
    B_pad = rows_pad * P

    # TODO(synk): for large B not a multiple of the tile, replace this pad with
    # a clamped index_map + masked store on the last block to avoid the extra
    # HBM copy of x.
    if B_pad != B:
        x = jnp.pad(x, ((0, B_pad - B), (0, 0)))
    x_packed = x.reshape(rows_pad, P * data_dim)           # free row-major view

    x_spec = pl.BlockSpec((bbp, P * data_dim), lambda i: (i, 0))
    param_specs = [
        pl.BlockSpec(p.shape, lambda i, nd=p.ndim: (0,) * nd)
        for p in param_list
    ]
    out_spec = pl.BlockSpec((bbp, P * data_dim), lambda i: (i, 0))

    out_packed = pl.pallas_call(
        functools.partial(autoencoder_kernel, act_dtype=act_dtype),
        out_shape=jax.ShapeDtypeStruct((rows_pad, P * data_dim), jnp.float32),
        grid=(rows_pad // bbp,),
        in_specs=[x_spec] + param_specs,
        out_specs=out_spec,
        compiler_params=pltpu.CompilerParams(
            dimension_semantics=("parallel",),
            vmem_limit_bytes=32 * 1024 * 1024,   # safe on v5e/v6e/v7x
        ),
    )(x_packed, *param_list)

    out = out_packed.reshape(B_pad, data_dim)
    if B_pad != B:
        out = out[:B]
    return out


def init_params(key, data_dim, latent_dim):
    """Deterministic init mirroring torch.nn.Linear defaults U(-1/sqrt(in), 1/sqrt(in))."""
    dims = [
        ("w1", "b1", data_dim, 4),
        ("w2", "b2", 4, 4),
        ("w3", "b3", 4, 16),
        ("wmu", "bmu", 16, latent_dim),
        ("dw1", "db1", latent_dim, 16),
        ("dw2", "db2", 16, 4),
        ("dw3", "db3", 4, 4),
        ("dw4", "db4", 4, data_dim),
    ]
    params = {}
    for wname, bname, fan_in, fan_out in dims:
        key, kw, kb = jax.random.split(key, 3)
        bound = 1.0 / (fan_in ** 0.5)
        params[wname] = jax.random.uniform(
            kw, (fan_in, fan_out), jnp.float32, -bound, bound
        )
        params[bname] = jax.random.uniform(
            kb, (1, fan_out), jnp.float32, -bound, bound
        )
    return params


def _ref_linear(x, w, b):
    return jnp.dot(x, w, precision=jax.lax.Precision.HIGHEST) + b


def reference_forward(x, p):
    """Pure-JAX reference matching the PyTorch forward (all f32)."""
    h = jax.nn.relu(_ref_linear(x, p["w1"], p["b1"]))
    h = jax.nn.relu(_ref_linear(h, p["w2"], p["b2"]))
    h = jax.nn.relu(_ref_linear(h, p["w3"], p["b3"]))
    z = _ref_linear(h, p["wmu"], p["bmu"])
    d = jax.nn.relu(_ref_linear(z, p["dw1"], p["db1"]))
    d = jax.nn.relu(_ref_linear(d, p["dw2"], p["db2"]))
    d = jax.nn.relu(_ref_linear(d, p["dw3"], p["db3"]))
    return jax.nn.sigmoid(_ref_linear(d, p["dw4"], p["db4"]))


if __name__ == "__main__":
    data_dim = 32
    latent_dim = 8
    batch = 50  # deliberately NOT a multiple of the packed tile -> exercises padding

    key = jax.random.PRNGKey(0)
    key, kx = jax.random.split(key)
    x = jax.random.uniform(kx, (batch, data_dim), jnp.float32)
    params = init_params(key, data_dim, latent_dim)

    ref = reference_forward(x, params)

    # Exact f32 path: explicit P=4 block-diag packing, small tiles so the grid
    # has multiple steps and the batch pad is exercised.
    out_f32 = jax.block_until_ready(
        autoencoder_forward(x, params, block_rows=64, pack=4,
                            use_bf16_matmul=False, bf16_activations=False)
    )
    assert out_f32.shape == (batch, data_dim)
    assert jnp.allclose(out_f32, ref, atol=1e-4, rtol=1e-4), "f32 path mismatch"

    # Default perf path: chip-dependent packing (P=4 on v5e, P=8 on v6e/v7x),
    # bf16 MXU operands (f32 accumulation), lane-dense packed I/O, large tiles.
    out_fast = jax.block_until_ready(autoencoder_forward(x, params))
    assert out_fast.shape == (batch, data_dim)
    assert jnp.allclose(out_fast, ref, atol=3e-2, rtol=3e-2), "bf16 path mismatch"

    print("KERNEL_OK")
</pallas_src>

<mosaic_0001>
module attributes {stable_mosaic.version = 11 : i64} {
  func.func @autoencoder_kernel(%arg0: i32, %arg1: memref<8x128xf32, #tpu.memory_space<vmem>>, %arg2: memref<128x16xf32, #tpu.memory_space<vmem>>, %arg3: memref<1x16xf32, #tpu.memory_space<vmem>>, %arg4: memref<16x16xf32, #tpu.memory_space<vmem>>, %arg5: memref<1x16xf32, #tpu.memory_space<vmem>>, %arg6: memref<16x64xf32, #tpu.memory_space<vmem>>, %arg7: memref<1x64xf32, #tpu.memory_space<vmem>>, %arg8: memref<64x32xf32, #tpu.memory_space<vmem>>, %arg9: memref<1x32xf32, #tpu.memory_space<vmem>>, %arg10: memref<32x64xf32, #tpu.memory_space<vmem>>, %arg11: memref<1x64xf32, #tpu.memory_space<vmem>>, %arg12: memref<64x16xf32, #tpu.memory_space<vmem>>, %arg13: memref<1x16xf32, #tpu.memory_space<vmem>>, %arg14: memref<16x16xf32, #tpu.memory_space<vmem>>, %arg15: memref<1x16xf32, #tpu.memory_space<vmem>>, %arg16: memref<16x128xf32, #tpu.memory_space<vmem>>, %arg17: memref<1x128xf32, #tpu.memory_space<vmem>>, %arg18: memref<8x128xf32, #tpu.memory_space<vmem>>) attributes {dimension_semantics = [#tpu.dimension_semantics<parallel>], iteration_bounds = array<i64: 2>, scalar_prefetch = 0 : i64, scratch_operands = 0 : i64, tpu.core_type = #tpu.core_type<tc>, window_params = [{transform_indices = @transform_0, window_bounds = array<i64: 8, 128>}, {pipeline_mode = #tpu.pipeline_mode<synchronous>, transform_indices = @transform_1, window_bounds = array<i64: 128, 16>}, {pipeline_mode = #tpu.pipeline_mode<synchronous>, transform_indices = @transform_2, window_bounds = array<i64: 1, 16>}, {pipeline_mode = #tpu.pipeline_mode<synchronous>, transform_indices = @transform_3, window_bounds = array<i64: 16, 16>}, {pipeline_mode = #tpu.pipeline_mode<synchronous>, transform_indices = @transform_4, window_bounds = array<i64: 1, 16>}, {pipeline_mode = #tpu.pipeline_mode<synchronous>, transform_indices = @transform_5, window_bounds = array<i64: 16, 64>}, {pipeline_mode = #tpu.pipeline_mode<synchronous>, transform_indices = @transform_6, window_bounds = array<i64: 1, 64>}, {pipeline_mode = #tpu.pipeline_mode<synchronous>, transform_indices = @transform_7, window_bounds = array<i64: 64, 32>}, {pipeline_mode = #tpu.pipeline_mode<synchronous>, transform_indices = @transform_8, window_bounds = array<i64: 1, 32>}, {pipeline_mode = #tpu.pipeline_mode<synchronous>, transform_indices = @transform_9, window_bounds = array<i64: 32, 64>}, {pipeline_mode = #tpu.pipeline_mode<synchronous>, transform_indices = @transform_10, window_bounds = array<i64: 1, 64>}, {pipeline_mode = #tpu.pipeline_mode<synchronous>, transform_indices = @transform_11, window_bounds = array<i64: 64, 16>}, {pipeline_mode = #tpu.pipeline_mode<synchronous>, transform_indices = @transform_12, window_bounds = array<i64: 1, 16>}, {pipeline_mode = #tpu.pipeline_mode<synchronous>, transform_indices = @transform_13, window_bounds = array<i64: 16, 16>}, {pipeline_mode = #tpu.pipeline_mode<synchronous>, transform_indices = @transform_14, window_bounds = array<i64: 1, 16>}, {pipeline_mode = #tpu.pipeline_mode<synchronous>, transform_indices = @transform_15, window_bounds = array<i64: 16, 128>}, {pipeline_mode = #tpu.pipeline_mode<synchronous>, transform_indices = @transform_16, window_bounds = array<i64: 1, 128>}, {transform_indices = @transform_17, window_bounds = array<i64: 8, 128>}]} {
    %c0 = arith.constant 0 : index
    %c0_0 = arith.constant 0 : index
    %0 = vector.load %arg1[%c0, %c0_0] : memref<8x128xf32, #tpu.memory_space<vmem>>, vector<8x128xf32>
    %c0_1 = arith.constant 0 : index
    %c0_2 = arith.constant 0 : index
    %1 = vector.load %arg2[%c0_1, %c0_2] : memref<128x16xf32, #tpu.memory_space<vmem>>, vector<128x16xf32>
    %cst = arith.constant dense<0.000000e+00> : vector<8x16xf32>
    %2 = tpu.matmul %0, %1, %cst {dimension_numbers = #tpu.dot_dimension_numbers<[1], [0], [0], [1], [0, 0, 1, 1], [], []>, precision = #tpu.contract_precision<fp32>} : vector<8x128xf32>, vector<128x16xf32>, vector<8x16xf32> -> vector<8x16xf32>
    %c0_3 = arith.constant 0 : index
    %c0_4 = arith.constant 0 : index
    %3 = vector.load %arg3[%c0_3, %c0_4] : memref<1x16xf32, #tpu.memory_space<vmem>>, vector<1x16xf32>
    %4 = vector.broadcast %3 : vector<1x16xf32> to vector<8x16xf32>
    %5 = arith.addf %2, %4 : vector<8x16xf32>
    %cst_5 = arith.constant 0.000000e+00 : f32
    %6 = vector.broadcast %cst_5 : f32 to vector<8x16xf32>
    %7 = arith.maximumf %5, %6 : vector<8x16xf32>
    %c0_6 = arith.constant 0 : index
    %c0_7 = arith.constant 0 : index
    %8 = vector.load %arg4[%c0_6, %c0_7] : memref<16x16xf32, #tpu.memory_space<vmem>>, vector<16x16xf32>
    %cst_8 = arith.constant dense<0.000000e+00> : vector<8x16xf32>
    %9 = tpu.matmul %7, %8, %cst_8 {dimension_numbers = #tpu.dot_dimension_numbers<[1], [0], [0], [1], [0, 0, 1, 1], [], []>, precision = #tpu.contract_precision<fp32>} : vector<8x16xf32>, vector<16x16xf32>, vector<8x16xf32> -> vector<8x16xf32>
    %c0_9 = arith.constant 0 : index
    %c0_10 = arith.constant 0 : index
    %10 = vector.load %arg5[%c0_9, %c0_10] : memref<1x16xf32, #tpu.memory_space<vmem>>, vector<1x16xf32>
    %11 = vector.broadcast %10 : vector<1x16xf32> to vector<8x16xf32>
    %12 = arith.addf %9, %11 : vector<8x16xf32>
    %cst_11 = arith.constant 0.000000e+00 : f32
    %13 = vector.broadcast %cst_11 : f32 to vector<8x16xf32>
    %14 = arith.maximumf %12, %13 : vector<8x16xf32>
    %c0_12 = arith.constant 0 : index
    %c0_13 = arith.constant 0 : index
    %15 = vector.load %arg6[%c0_12, %c0_13] : memref<16x64xf32, #tpu.memory_space<vmem>>, vector<16x64xf32>
    %cst_14 = arith.constant dense<0.000000e+00> : vector<8x64xf32>
    %16 = tpu.matmul %14, %15, %cst_14 {dimension_numbers = #tpu.dot_dimension_numbers<[1], [0], [0], [1], [0, 0, 1, 1], [], []>, precision = #tpu.contract_precision<fp32>} : vector<8x16xf32>, vector<16x64xf32>, vector<8x64xf32> -> vector<8x64xf32>
    %c0_15 = arith.constant 0 : index
    %c0_16 = arith.constant 0 : index
    %17 = vector.load %arg7[%c0_15, %c0_16] : memref<1x64xf32, #tpu.memory_space<vmem>>, vector<1x64xf32>
    %18 = vector.broadcast %17 : vector<1x64xf32> to vector<8x64xf32>
    %19 = arith.addf %16, %18 : vector<8x64xf32>
    %cst_17 = arith.constant 0.000000e+00 : f32
    %20 = vector.broadcast %cst_17 : f32 to vector<8x64xf32>
    %21 = arith.maximumf %19, %20 : vector<8x64xf32>
    %c0_18 = arith.constant 0 : index
    %c0_19 = arith.constant 0 : index
    %22 = vector.load %arg8[%c0_18, %c0_19] : memref<64x32xf32, #tpu.memory_space<vmem>>, vector<64x32xf32>
    %cst_20 = arith.constant dense<0.000000e+00> : vector<8x32xf32>
    %23 = tpu.matmul %21, %22, %cst_20 {dimension_numbers = #tpu.dot_dimension_numbers<[1], [0], [0], [1], [0, 0, 1, 1], [], []>, precision = #tpu.contract_precision<fp32>} : vector<8x64xf32>, vector<64x32xf32>, vector<8x32xf32> -> vector<8x32xf32>
    %c0_21 = arith.constant 0 : index
    %c0_22 = arith.constant 0 : index
    %24 = vector.load %arg9[%c0_21, %c0_22] : memref<1x32xf32, #tpu.memory_space<vmem>>, vector<1x32xf32>
    %25 = vector.broadcast %24 : vector<1x32xf32> to vector<8x32xf32>
    %26 = arith.addf %23, %25 : vector<8x32xf32>
    %c0_23 = arith.constant 0 : index
    %c0_24 = arith.constant 0 : index
    %27 = vector.load %arg10[%c0_23, %c0_24] : memref<32x64xf32, #tpu.memory_space<vmem>>, vector<32x64xf32>
    %cst_25 = arith.constant dense<0.000000e+00> : vector<8x64xf32>
    %28 = tpu.matmul %26, %27, %cst_25 {dimension_numbers = #tpu.dot_dimension_numbers<[1], [0], [0], [1], [0, 0, 1, 1], [], []>, precision = #tpu.contract_precision<fp32>} : vector<8x32xf32>, vector<32x64xf32>, vector<8x64xf32> -> vector<8x64xf32>
    %c0_26 = arith.constant 0 : index
    %c0_27 = arith.constant 0 : index
    %29 = vector.load %arg11[%c0_26, %c0_27] : memref<1x64xf32, #tpu.memory_space<vmem>>, vector<1x64xf32>
    %30 = vector.broadcast %29 : vector<1x64xf32> to vector<8x64xf32>
    %31 = arith.addf %28, %30 : vector<8x64xf32>
    %cst_28 = arith.constant 0.000000e+00 : f32
    %32 = vector.broadcast %cst_28 : f32 to vector<8x64xf32>
    %33 = arith.maximumf %31, %32 : vector<8x64xf32>
    %c0_29 = arith.constant 0 : index
    %c0_30 = arith.constant 0 : index
    %34 = vector.load %arg12[%c0_29, %c0_30] : memref<64x16xf32, #tpu.memory_space<vmem>>, vector<64x16xf32>
    %cst_31 = arith.constant dense<0.000000e+00> : vector<8x16xf32>
    %35 = tpu.matmul %33, %34, %cst_31 {dimension_numbers = #tpu.dot_dimension_numbers<[1], [0], [0], [1], [0, 0, 1, 1], [], []>, precision = #tpu.contract_precision<fp32>} : vector<8x64xf32>, vector<64x16xf32>, vector<8x16xf32> -> vector<8x16xf32>
    %c0_32 = arith.constant 0 : index
    %c0_33 = arith.constant 0 : index
    %36 = vector.load %arg13[%c0_32, %c0_33] : memref<1x16xf32, #tpu.memory_space<vmem>>, vector<1x16xf32>
    %37 = vector.broadcast %36 : vector<1x16xf32> to vector<8x16xf32>
    %38 = arith.addf %35, %37 : vector<8x16xf32>
    %cst_34 = arith.constant 0.000000e+00 : f32
    %39 = vector.broadcast %cst_34 : f32 to vector<8x16xf32>
    %40 = arith.maximumf %38, %39 : vector<8x16xf32>
    %c0_35 = arith.constant 0 : index
    %c0_36 = arith.constant 0 : index
    %41 = vector.load %arg14[%c0_35, %c0_36] : memref<16x16xf32, #tpu.memory_space<vmem>>, vector<16x16xf32>
    %cst_37 = arith.constant dense<0.000000e+00> : vector<8x16xf32>
    %42 = tpu.matmul %40, %41, %cst_37 {dimension_numbers = #tpu.dot_dimension_numbers<[1], [0], [0], [1], [0, 0, 1, 1], [], []>, precision = #tpu.contract_precision<fp32>} : vector<8x16xf32>, vector<16x16xf32>, vector<8x16xf32> -> vector<8x16xf32>
    %c0_38 = arith.constant 0 : index
    %c0_39 = arith.constant 0 : index
    %43 = vector.load %arg15[%c0_38, %c0_39] : memref<1x16xf32, #tpu.memory_space<vmem>>, vector<1x16xf32>
    %44 = vector.broadcast %43 : vector<1x16xf32> to vector<8x16xf32>
    %45 = arith.addf %42, %44 : vector<8x16xf32>
    %cst_40 = arith.constant 0.000000e+00 : f32
    %46 = vector.broadcast %cst_40 : f32 to vector<8x16xf32>
    %47 = arith.maximumf %45, %46 : vector<8x16xf32>
    %c0_41 = arith.constant 0 : index
    %c0_42 = arith.constant 0 : index
    %48 = vector.load %arg16[%c0_41, %c0_42] : memref<16x128xf32, #tpu.memory_space<vmem>>, vector<16x128xf32>
    %cst_43 = arith.constant dense<0.000000e+00> : vector<8x128xf32>
    %49 = tpu.matmul %47, %48, %cst_43 {dimension_numbers = #tpu.dot_dimension_numbers<[1], [0], [0], [1], [0, 0, 1, 1], [], []>, precision = #tpu.contract_precision<fp32>} : vector<8x16xf32>, vector<16x128xf32>, vector<8x128xf32> -> vector<8x128xf32>
    %c0_44 = arith.constant 0 : index
    %c0_45 = arith.constant 0 : index
    %50 = vector.load %arg17[%c0_44, %c0_45] : memref<1x128xf32, #tpu.memory_space<vmem>>, vector<1x128xf32>
    %51 = vector.broadcast %50 : vector<1x128xf32> to vector<8x128xf32>
    %52 = arith.addf %49, %51 : vector<8x128xf32>
    %53 = arith.negf %52 : vector<8x128xf32>
    %54 = math.exp %53 : vector<8x128xf32>
    %cst_46 = arith.constant 1.000000e+00 : f32
    %55 = vector.broadcast %cst_46 : f32 to vector<8x128xf32>
    %56 = arith.addf %55, %54 : vector<8x128xf32>
    %57 = arith.divf %55, %56 : vector<8x128xf32>
    %c0_47 = arith.constant 0 : index
    %c0_48 = arith.constant 0 : index
    %58 = vector.load %arg18[%c0_47, %c0_48] : memref<8x128xf32, #tpu.memory_space<vmem>>, vector<8x128xf32>
    tpu.vector_store %arg18[%c0_47, %c0_48], %57 {strides = array<i32>} : memref<8x128xf32, #tpu.memory_space<vmem>>, vector<8x128xf32>,
    return
  }
  func.func @transform_0(%arg0: i32) -> (i32, i32) {
    %c0_i32 = arith.constant 0 : i32
    %c0_i32_0 = arith.constant 0 : i32
    return %arg0, %c0_i32 : i32, i32
  }
  func.func @transform_1(%arg0: i32) -> (i32, i32) {
    %c0_i32 = arith.constant 0 : i32
    %c0_i32_0 = arith.constant 0 : i32
    %c0_i32_1 = arith.constant 0 : i32
    return %c0_i32, %c0_i32_0 : i32, i32
  }
  func.func @transform_2(%arg0: i32) -> (i32, i32) {
    %c0_i32 = arith.constant 0 : i32
    %c0_i32_0 = arith.constant 0 : i32
    %c0_i32_1 = arith.constant 0 : i32
    return %c0_i32, %c0_i32_0 : i32, i32
  }
  func.func @transform_3(%arg0: i32) -> (i32, i32) {
    %c0_i32 = arith.constant 0 : i32
    %c0_i32_0 = arith.constant 0 : i32
    %c0_i32_1 = arith.constant 0 : i32
    return %c0_i32, %c0_i32_0 : i32, i32
  }
  func.func @transform_4(%arg0: i32) -> (i32, i32) {
    %c0_i32 = arith.constant 0 : i32
    %c0_i32_0 = arith.constant 0 : i32
    %c0_i32_1 = arith.constant 0 : i32
    return %c0_i32, %c0_i32_0 : i32, i32
  }
  func.func @transform_5(%arg0: i32) -> (i32, i32) {
    %c0_i32 = arith.constant 0 : i32
    %c0_i32_0 = arith.constant 0 : i32
    %c0_i32_1 = arith.constant 0 : i32
    return %c0_i32, %c0_i32_0 : i32, i32
  }
  func.func @transform_6(%arg0: i32) -> (i32, i32) {
    %c0_i32 = arith.constant 0 : i32
    %c0_i32_0 = arith.constant 0 : i32
    %c0_i32_1 = arith.constant 0 : i32
    return %c0_i32, %c0_i32_0 : i32, i32
  }
  func.func @transform_7(%arg0: i32) -> (i32, i32) {
    %c0_i32 = arith.constant 0 : i32
    %c0_i32_0 = arith.constant 0 : i32
    %c0_i32_1 = arith.constant 0 : i32
    return %c0_i32, %c0_i32_0 : i32, i32
  }
  func.func @transform_8(%arg0: i32) -> (i32, i32) {
    %c0_i32 = arith.constant 0 : i32
    %c0_i32_0 = arith.constant 0 : i32
    %c0_i32_1 = arith.constant 0 : i32
    return %c0_i32, %c0_i32_0 : i32, i32
  }
  func.func @transform_9(%arg0: i32) -> (i32, i32) {
    %c0_i32 = arith.constant 0 : i32
    %c0_i32_0 = arith.constant 0 : i32
    %c0_i32_1 = arith.constant 0 : i32
    return %c0_i32, %c0_i32_0 : i32, i32
  }
  func.func @transform_10(%arg0: i32) -> (i32, i32) {
    %c0_i32 = arith.constant 0 : i32
    %c0_i32_0 = arith.constant 0 : i32
    %c0_i32_1 = arith.constant 0 : i32
    return %c0_i32, %c0_i32_0 : i32, i32
  }
  func.func @transform_11(%arg0: i32) -> (i32, i32) {
    %c0_i32 = arith.constant 0 : i32
    %c0_i32_0 = arith.constant 0 : i32
    %c0_i32_1 = arith.constant 0 : i32
    return %c0_i32, %c0_i32_0 : i32, i32
  }
  func.func @transform_12(%arg0: i32) -> (i32, i32) {
    %c0_i32 = arith.constant 0 : i32
    %c0_i32_0 = arith.constant 0 : i32
    %c0_i32_1 = arith.constant 0 : i32
    return %c0_i32, %c0_i32_0 : i32, i32
  }
  func.func @transform_13(%arg0: i32) -> (i32, i32) {
    %c0_i32 = arith.constant 0 : i32
    %c0_i32_0 = arith.constant 0 : i32
    %c0_i32_1 = arith.constant 0 : i32
    return %c0_i32, %c0_i32_0 : i32, i32
  }
  func.func @transform_14(%arg0: i32) -> (i32, i32) {
    %c0_i32 = arith.constant 0 : i32
    %c0_i32_0 = arith.constant 0 : i32
    %c0_i32_1 = arith.constant 0 : i32
    return %c0_i32, %c0_i32_0 : i32, i32
  }
  func.func @transform_15(%arg0: i32) -> (i32, i32) {
    %c0_i32 = arith.constant 0 : i32
    %c0_i32_0 = arith.constant 0 : i32
    %c0_i32_1 = arith.constant 0 : i32
    return %c0_i32, %c0_i32_0 : i32, i32
  }
  func.func @transform_16(%arg0: i32) -> (i32, i32) {
    %c0_i32 = arith.constant 0 : i32
    %c0_i32_0 = arith.constant 0 : i32
    %c0_i32_1 = arith.constant 0 : i32
    return %c0_i32, %c0_i32_0 : i32, i32
  }
  func.func @transform_17(%arg0: i32) -> (i32, i32) {
    %c0_i32 = arith.constant 0 : i32
    %c0_i32_0 = arith.constant 0 : i32
    return %arg0, %c0_i32 : i32, i32
  }
}

</mosaic_0001>

<bundles_post_ra>
// kernel: tpu_custom_call.1
= control target key start
LH: loop header
LB: loop body
LE: loop exit
PB: predicated region body
PF: predicated region fallthrough
CT: control target
= control target key end

     0   :  { %s7424_s0 = inlined_call_operand.vmem [shape: f32[16,128], index: 0, kind: input, shape index: {}]   ;;  %s7425_s1 = inlined_call_operand.vmem [shape: f32[128,16], index: 1, kind: input, shape index: {}]   ;;  %s7426_s2 = inlined_call_operand.vmem [shape: f32[1,16], index: 2, kind: input, shape index: {}]   ;;  %s7427_s3 = inlined_call_operand.vmem [shape: f32[16,16], index: 3, kind: input, shape index: {}]   ;;  %s7428_s4 = inlined_call_operand.vmem [shape: f32[1,16], index: 4, kind: input, shape index: {}]   ;;  %s7429_s5 = inlined_call_operand.vmem [shape: f32[16,64], index: 5, kind: input, shape index: {}]   ;;  %s7430_s6 = inlined_call_operand.vmem [shape: f32[1,64], index: 6, kind: input, shape index: {}]   ;;  %s7431_s7 = inlined_call_operand.vmem [shape: f32[64,32], index: 7, kind: input, shape index: {}]   ;;  %s7432_s8 = inlined_call_operand.vmem [shape: f32[1,32], index: 8, kind: input, shape index: {}]   ;;  %s7433_s9 = inlined_call_operand.vmem [shape: f32[32,64], index: 9, kind: input, shape index: {}]   ;;  %s7434_s10 = inlined_call_operand.vmem [shape: f32[1,64], index: 10, kind: input, shape index: {}]   ;;  %s7435_s11 = inlined_call_operand.vmem [shape: f32[64,16], index: 11, kind: input, shape index: {}]   ;;  %s7436_s12 = inlined_call_operand.vmem [shape: f32[1,16], index: 12, kind: input, shape index: {}]   ;;  %s7437_s13 = inlined_call_operand.vmem [shape: f32[16,16], index: 13, kind: input, shape index: {}]   ;;  %s7438_s14 = inlined_call_operand.vmem [shape: f32[1,16], index: 14, kind: input, shape index: {}]   ;;  %s7439_s15 = inlined_call_operand.vmem [shape: f32[16,128], index: 15, kind: input, shape index: {}]   ;;  %s7440_s16 = inlined_call_operand.vmem [shape: f32[1,128], index: 16, kind: input, shape index: {}]   ;;  %s7441_s17 = inlined_call_operand.hbm [shape: f32[16,128], index: 17, kind: output, shape index: {}]  }
   0x1   :  { %7462 = sst [smem:[#allocation7_spill]] %s7424_s0 }
   0x2   :  { %7463 = sst [smem:[#allocation8_spill]] %s7425_s1 }
   0x3   :  { %7464 = sst [smem:[#allocation9_spill]] %s7426_s2 }
   0x4   :  { %7465 = sst [smem:[#allocation10_spill]] %s7427_s3 }
   0x5   :  { %7466 = sst [smem:[#allocation11_spill]] %s7428_s4 }
   0x6   :  { %7467 = sst [smem:[#allocation12_spill]] %s7429_s5 }
   0x7   :  { %22 = vsyncpa [#allocation3], 0 }
   0x8   :  { %24 = vsyncpa [#allocation3 + $0x1], 0  ;;  %s6480_s24 = smov 0   ;;  %s6482_s25 = smov 0  }
   0x9   :  { %s6484_s26 = smov 0   ;;  %s6486_s27 = smov 0  }
   0xa LB: > { %7468 = sst [smem:[#allocation5_spill]] %s6380_s26  ;;  %s6501_s28 = sadd.s32 4294967295, %s6384_s27   ;;  %s6384_s27 = sphi %s6486_s27, %s7499_s27   ;;  %s6380_s26 = sphi %s6484_s26, %s7496_s26   ;;  %s6376_s25 = sphi %s6482_s25, %s7498_s25   ;;  %s6372_s24 = sphi %s6480_s24, %s7497_s24  }
   0xb   : > { %s4791_s29 = sadd.s32 4294967294, %s6384_s27   ;;  %s6505_s0 = sadd.s32 1, %s6384_s27  }
   0xc   : > { %s399_s30 = sadd.s32 1, %s6380_s26  ;;  %s396_s18 = ssub.s32 %s6384_s27, %s6505_s0 }
   0xd   : > { %p409_p0 = scmp.ne.s32.totalorder %s6380_s26, %s6376_s25  ;;  %p397_p1 = scmp.eq.s32.totalorder %s396_s18, 0 }
   0xe   : > { %p410_p2 = scmp.eq.s32.totalorder %s6501_s28, 1  ;;  %p415_p3 = scmp.ne.s32.totalorder %s6376_s25, %s6372_s24 }
   0xf   : > { %p416_p4 = scmp.eq.s32.totalorder %s4791_s29, 1  ;;  %p4794_p7 = scmp.ge.s32.totalorder %s6384_s27, 1 }
  0x10   : > { %s6516_s19 = scalar_select %p397_p1, %s6380_s26, %s399_s30  }
  0x11   : > { %p6518_p5 = por %p410_p2, %p409_p0  ;;  %p6522_p6 = por %p416_p4, %p415_p3 }
  0x12   : > { %7469 = sst [smem:[#allocation6_spill]] %s6516_s19  ;;  %p489_p8 = scmp.lt.s32.totalorder %s6384_s27, 3 }
  0x14   : > { %p490_p9 = pnand %p4794_p7, %p489_p8 }
  0x15   : > { %s7472_s23 = sld [smem:[#allocation8_spill]] (!%p490_p9)  ;;  %v6386_v3 = vmov (!%p490_p9), 0.0|0.0   ;;  %vm6387_vm0 = vmmov (!%p490_p9), 0   ;;  %v7445_v10 = vmov (!%p490_p9), 0.0   ;;  %p540_p10 = scmp.lt.s32.totalorder (!%p490_p9), %s6501_s28, 1  ;;  %vm1219_vm1 = vcmask (!%p490_p9), 130048  }
  0x16   : > { %493 = sbr.rel (%p490_p9) target bundleno = 2384 (0x950), region = 88  ;;  %5818 = vmatprep.subr.bf16.mxu0 (!%p490_p9), %v6386_v3  ;;  %5189 = vmatprep.mubr.msk.f32.mxu0 (!%p490_p9), %vm6387_vm0, %v7445_v10  ;;  %s7479_s19 = sld [smem:[#allocation7_spill]] (!%p490_p9)  ;;  %vm2170_vm2 = vcmask (!%p490_p9), 523264   ;;  %vm2722_vm3 = vcmask (!%p490_p9), 261120  }
  0x17   : > { %5794 = vmatprep.subr.bf16.mxu1 (!%p490_p9), %v6386_v3  ;;  %5154 = vmatprep.mubr.msk.f32.mxu1 (!%p490_p9), %vm6387_vm0, %v7445_v10  ;;  %s7491_s3 = sld [smem:[#allocation10_spill]] (!%p490_p9)  ;;  %s7492_s2 = sld [smem:[#allocation9_spill]] (!%p490_p9) }
  0x18   : > { %s7493_s5 = sld [smem:[#allocation12_spill]] (!%p490_p9)  ;;  %s7494_s4 = sld [smem:[#allocation11_spill]] (!%p490_p9) }
  0x19   : > { %s4807_s29 = sshll.u32 (!%p490_p9), %s6501_s28, 7 }
  0x1b   : > { %v6531_v0 = vld [vmem:[%s7472_s23] sm:$0xff] (!%p490_p9)  ;;  %v6536_v1 = vld [vmem:[%s7472_s23 + $0x8] sm:$0xff] (!%p490_p9)  ;;  %v6541_v2 = vld [vmem:[%s7472_s23 + $0x10] sm:$0xff] (!%p490_p9) }
  0x1c   : > { %v569_v4 = vand.u32 (!%p490_p9), 4294901760, %v6531_v0  ;;  %v572_v5 = vand.u32 (!%p490_p9), 4294901760, %v6536_v1  ;;  %v6549_v6 = vld [vmem:[%s7472_s23 + $0x18] sm:$0xff] (!%p490_p9)  ;;  %v575_v7 = vand.u32 (!%p490_p9), 4294901760, %v6541_v2  ;;  %v6555_v8 = vld [vmem:[%s7472_s23 + $0x20] sm:$0xff] (!%p490_p9)  ;;  %v6560_v9 = vld [vmem:[%s7472_s23 + $0x28] sm:$0xff] (!%p490_p9) }
  0x1d   : > { %v578_v11 = vand.u32 4294901760, %v6549_v6  ;;  %v7456_v12 = vand.u32 4294901760, %v6555_v8  ;;  %v7454_v13 = vand.u32 4294901760, %v6560_v9  ;;  %v6570_v14 = vld [vmem:[%s7472_s23 + $0x30] sm:$0xff]  ;;  %v6575_v15 = vld [vmem:[%s7472_s23 + $0x38] sm:$0xff]  ;;  %v6651_v40 = vld [vmem:[%s7472_s23 + $0x40] sm:$0xff] }
  0x1e   : > { %v6583_v16 = vsub.f32 %v6531_v0, %v569_v4  ;;  %v6588_v17 = vsub.f32 %v6536_v1, %v572_v5  ;;  %v6593_v18 = vsub.f32 %v6541_v2, %v575_v7  ;;  %v7453_v19 = vand.u32 4294901760, %v6570_v14  ;;  %v6656_v41 = vld [vmem:[%s7472_s23 + $0x48] sm:$0xff]  ;;  %v6661_v45 = vld [vmem:[%s7472_s23 + $0x50] sm:$0xff]  ;;  %v6669_v48 = vld [vmem:[%s7472_s23 + $0x58] sm:$0xff]  ;;  %s541_s21 = scalar_select %p540_p10, %s6501_s28, 1 }
  0x1f   : > { %v6599_v20 = vsub.f32 %v6549_v6, %v578_v11  ;;  %v6604_v21 = vsub.f32 %v6555_v8, %v7456_v12  ;;  %v6609_v22 = vsub.f32 %v6560_v9, %v7454_v13  ;;  %v7452_v23 = vand.u32 4294901760, %v6575_v15  ;;  %v6674_v49 = vld [vmem:[%s7472_s23 + $0x60] sm:$0xff]  ;;  %v6681_v54 = vld [vmem:[%s7472_s23 + $0x68] sm:$0xff]  ;;  %v6686_v55 = vld [vmem:[%s7472_s23 + $0x70] sm:$0xff]  ;;  %s6389_s28 = smov [#allocation2]  }
  0x20   : > { %v662_v24 = vand.u32 4294901760, %v6583_v16  ;;  %v669_v25 = vand.u32 4294901760, %v6588_v17  ;;  %v676_v26 = vand.u32 4294901760, %v6593_v18  ;;  %v6618_v27 = vsub.f32 %v6570_v14, %v7453_v19  ;;  %s4796_s22 = sshll.u32 %s541_s21, 3 }
  0x21   : > { %v683_v28 = vand.u32 4294901760, %v6599_v20  ;;  %v7460_v29 = vand.u32 4294901760, %v6604_v21  ;;  %v7459_v30 = vand.u32 4294901760, %v6609_v22  ;;  %v6626_v31 = vsub.f32 %v6575_v15, %v7452_v23  ;;  %s543_s26 = scalar_lea.vmem %s7479_s19, %s4796_s22 }
  0x22   : > { %v663_v32 = vsub.f32 %v6583_v16, %v662_v24  ;;  %v670_v33 = vsub.f32 %v6588_v17, %v669_v25  ;;  %v677_v34 = vsub.f32 %v6593_v18, %v676_v26  ;;  %v7458_v35 = vand.u32 4294901760, %v6618_v27 }
  0x23   : > { %v684_v36 = vsub.f32 %v6599_v20, %v683_v28  ;;  %v691_v37 = vsub.f32 %v6604_v21, %v7460_v29  ;;  %v698_v38 = vsub.f32 %v6609_v22, %v7459_v30  ;;  %v7457_v39 = vand.u32 4294901760, %v6626_v31 }
  0x24   : > { %v664_v42 = vand.u32 4294901760, %v663_v32  ;;  %v671_v43 = vand.u32 4294901760, %v670_v33  ;;  %v678_v44 = vand.u32 4294901760, %v677_v34  ;;  %v705_v47 = vsub.f32 %v6618_v27, %v7458_v35  ;;  %v6707_v32 = vld [vmem:[%s7472_s23 + $0x78] sm:$0xff] }
  0x25   : > { %v685_v46 = vand.u32 4294901760, %v684_v36  ;;  %v692_v51 = vand.u32 4294901760, %v691_v37  ;;  %v7449_v52 = vand.u32 4294901760, %v6651_v40  ;;  %v7448_v53 = vand.u32 4294901760, %v6656_v41 }
  0x26   : > { %v5819_v50 = vpack.c.bf16 %v671_v43, %v664_v42  ;;  %v699_v57 = vand.u32 4294901760, %v698_v38  ;;  %v712_v58 = vsub.f32 %v6626_v31, %v7457_v39  ;;  %v7444_v59 = vand.u32 4294901760, %v6661_v45 }
  0x27   : > { %v5822_v56 = vpack.c.bf16 %v685_v46, %v678_v44  ;;  %v6695_v60 = vsub.f32 %v6651_v40, %v7449_v52  ;;  %v6700_v61 = vsub.f32 %v6656_v41, %v7448_v53  ;;  %v7447_v62 = vand.u32 4294901760, %v6669_v48 }
  0x28   : > { %5820 = vmatpush3.bf16.msra.mxu0 %v5819_v50  ;;  %v7451_v63 = vand.u32 4294901760, %v6674_v49  ;;  %v706_v33 = vand.u32 4294901760, %v705_v47  ;;  %v6713_v34 = vsub.f32 %v6661_v45, %v7444_v59  ;;  %v7450_v36 = vand.u32 4294901760, %v6681_v54 }
  0x29   : > { %5821 = vmatprep.subr.bf16.mxu0 %v6386_v3  ;;  %v7455_v37 = vand.u32 4294901760, %v6686_v55  ;;  %v718_v38 = vand.u32 4294901760, %v6695_v60  ;;  %v725_v42 = vand.u32 4294901760, %v6700_v61  ;;  %v6722_v43 = vsub.f32 %v6669_v48, %v7447_v62 }
  0x2a   : > { %v6727_v44 = vsub.f32 %v6674_v49, %v7451_v63  ;;  %v5825_v46 = vpack.c.bf16 %v699_v57, %v692_v51  ;;  %v732_v47 = vand.u32 4294901760, %v6713_v34  ;;  %v6733_v50 = vsub.f32 %v6681_v54, %v7450_v36 }
  0x2b   : > { %v7461_v59 = vand.u32 4294901760, %v6707_v32  ;;  %v713_v10 = vand.u32 4294901760, %v712_v58  ;;  %v719_v62 = vsub.f32 %v6695_v60, %v718_v38  ;;  %v726_v53 = vsub.f32 %v6700_v61, %v725_v42 }
  0x2c   : > { %5823 = vmatpush3.bf16.msra.mxu0 %v5822_v56  ;;  %v739_v52 = vand.u32 4294901760, %v6722_v43  ;;  %v746_v51 = vand.u32 4294901760, %v6727_v44  ;;  %v6744_v57 = vsub.f32 %v6686_v55, %v7455_v37  ;;  %v733_v36 = vsub.f32 %v6713_v34, %v732_v47 }
  0x2d   : > { %5824 = vmatprep.subr.bf16.mxu0 %v6386_v3  ;;  %v753_v58 = vand.u32 4294901760, %v6733_v50  ;;  %v6752_v63 = vsub.f32 %v6707_v32, %v7461_v59  ;;  %v5828_v23 = vpack.c.bf16 %v713_v10, %v706_v33  ;;  %v720_v19 = vand.u32 4294901760, %v719_v62 }
  0x2e   : > { %v740_v56 = vsub.f32 %v6722_v43, %v739_v52  ;;  %v727_v13 = vand.u32 4294901760, %v726_v53  ;;  %v747_v37 = vsub.f32 %v6727_v44, %v746_v51  ;;  %v760_v12 = vand.u32 4294901760, %v6744_v57 }
  0x2f   : > { %v734_v39 = vand.u32 4294901760, %v733_v36  ;;  %v754_v30 = vsub.f32 %v6733_v50, %v753_v58  ;;  %v767_v29 = vand.u32 4294901760, %v6752_v63  ;;  %v6764_v10 = vpack.c.bf16 %v572_v5, %v569_v4 }
  0x30   : > { %5826 = vmatpush3.bf16.msra.mxu0 %v5825_v46  ;;  %v741_v35 = vand.u32 4294901760, %v740_v56  ;;  %v5831_v59 = vpack.c.bf16 %v727_v13, %v720_v19  ;;  %v761_v53 = vsub.f32 %v6744_v57, %v760_v12  ;;  %v748_v33 = vand.u32 4294901760, %v747_v37 }
  0x31   : > { %5827 = vmatprep.subr.bf16.mxu0 %v6386_v3  ;;  %v755_v36 = vand.u32 4294901760, %v754_v30  ;;  %v768_v46 = vsub.f32 %v6752_v63, %v767_v29  ;;  %5796 = vmatpush3.bf16.msra.mxu1 %v6764_v10  ;;  %v6775_v0 = vpack.c.bf16 %v578_v11, %v575_v7  ;;  %v6781_v1 = vpack.c.bf16 %v669_v25, %v662_v24 }
  0x32   : > { %v5834_v62 = vpack.c.bf16 %v741_v35, %v734_v39  ;;  %v6787_v4 = vpack.c.bf16 %v683_v28, %v676_v26  ;;  %v7473_v5 = vand.u32 4294901760, %v6604_v21  ;;  %v7474_v2 = vand.u32 4294901760, %v6609_v22  ;;  %5797 = vmatprep.subr.bf16.mxu1 %v6386_v3 }
  0x33   : > { %v7475_v6 = vand.u32 4294901760, %v6618_v27  ;;  %v7476_v7 = vand.u32 4294901760, %v6626_v31  ;;  %v6802_v19 = vpack.c.bf16 %v725_v42, %v718_v38  ;;  %v6806_v24 = vpack.c.bf16 %v753_v58, %v746_v51 }
  0x34   : > { %5829 = vmatpush3.bf16.msra.mxu0 %v5828_v23  ;;  %v6793_v13 = vpack.c.bf16 %v7474_v2, %v7473_v5  ;;  %v6804_v23 = vpack.c.bf16 %v739_v52, %v732_v47  ;;  %v6809_v25 = vpack.c.bf16 %v767_v29, %v760_v12  ;;  %v5837_v26 = vpack.c.bf16 %v755_v36, %v748_v33  ;;  %v544_v29 = vld [vmem:[%s543_s26] sm:$0xff] }
  0x35   : > { %5830 = vmatprep.subr.bf16.mxu0 %v6386_v3  ;;  %v6800_v11 = vpack.c.bf16 %v7476_v7, %v7475_v6  ;;  %5799 = vmatpush3.bf16.msra.mxu1 %v6775_v0  ;;  %v762_v28 = vand.u32 4294901760, %v761_v53  ;;  %v769_v30 = vand.u32 4294901760, %v768_v46  ;;  %v7477_v35 = vand.u32 4294901760, %v6555_v8 }
  0x36   : > { %5800 = vmatprep.subr.bf16.mxu1 %v6386_v3  ;;  %v7478_v39 = vand.u32 4294901760, %v6560_v9  ;;  %v7481_v8 = vand.u32 4294901760, %v6575_v15  ;;  %v6833_v37 = vand.u32 4294901760, %v544_v29  ;;  %v5843_v38 = vpack.c.bf16 %v6588_v17, %v6583_v16 }
  0x37   : > { %v5840_v12 = vpack.c.bf16 %v769_v30, %v762_v28  ;;  %v7482_v42 = vand.u32 4294901760, %v6651_v40  ;;  %v5846_v15 = vpack.c.bf16 %v6599_v20, %v6593_v18  ;;  %v7484_v51 = vmov 0.0  }
  0x38   : > { %5832 = vmatpush3.bf16.msra.mxu0 %v5831_v59  ;;  %v6817_v52 = vpack.c.bf16 %v7478_v39, %v7477_v35  ;;  %v7480_v59 = vand.u32 4294901760, %v6570_v14  ;;  %v7483_v14 = vand.u32 4294901760, %v6656_v41  ;;  %v7485_v16 = vand.u32 4294901760, %v6661_v45  ;;  %v1683_v39 = vld [vmem:[%s7493_s5] sm:$0xff] }
  0x39   : > { %5833 = vmatprep.subr.bf16.mxu0 %v6386_v3  ;;  %v7486_v17 = vand.u32 4294901760, %v6669_v48  ;;  %v650_v41 = vsub.f32 %v544_v29, %v6833_v37  ;;  %v5849_v18 = vpack.c.bf16 %v6609_v22, %v6604_v21  ;;  %v7487_v20 = vand.u32 4294901760, %v6674_v49 }
  0x3a   : > { %5802 = vmatpush3.bf16.msra.mxu1 %v6817_v52  ;;  %v6829_v9 = vpack.c.bf16 %v7481_v8, %v7480_v59  ;;  %v6842_v47 = vpack.c.bf16 %v7483_v14, %v7482_v42  ;;  %v7488_v45 = vand.u32 4294901760, %v6681_v54  ;;  %v5852_v53 = vpack.c.bf16 %v6626_v31, %v6618_v27 }
  0x3b   : > { %5803 = vmatprep.subr.bf16.mxu1 %v6386_v3  ;;  %v6856_v40 = vpack.c.bf16 %v7486_v17, %v7485_v16  ;;  %v651_v56 = vand.u32 4294901760, %v650_v41  ;;  %v7490_v21 = vand.u32 4294901760, %v6707_v32  ;;  %v5855_v54 = vpack.c.bf16 %v6700_v61, %v6695_v60  ;;  %v1210_v60 = vld [vmem:[%s7491_s3] sm:$0xff]  ;;  %v1211_v61 = vld [vmem:[%s7491_s3 + $0x8] sm:$0xff] }
  0x3c   : > { %5835 = vmatpush3.bf16.msra.mxu0 %v5834_v62  ;;  %v6868_v48 = vpack.c.bf16 %v7488_v45, %v7487_v20  ;;  %v7489_v62 = vand.u32 4294901760, %v6686_v55  ;;  %v5858_v27 = vpack.c.bf16 %v6722_v43, %v6713_v34  ;;  %v5861_v31 = vpack.c.bf16 %v6733_v50, %v6727_v44 }
  0x3d   : > { %5836 = vmatprep.subr.bf16.mxu0 %v6386_v3  ;;  %v652_v58 = vsub.f32 %v650_v41, %v651_v56  ;;  %v5864_v55 = vpack.c.bf16 %v6752_v63, %v6744_v57  ;;  %v1224_v63 = vand.u32 4294901760, %v1210_v60  ;;  %v1227_v32 = vand.u32 4294901760, %v1211_v61 }
  0x3e   : > { %5805 = vmatpush3.bf16.msra.mxu1 %v6829_v9  ;;  %v6879_v22 = vpack.c.bf16 %v7490_v21, %v7489_v62 }
  0x3f   : > { %5806 = vmatprep.subr.bf16.mxu1 %v6386_v3  ;;  %v653_v49 = vand.u32 4294901760, %v652_v58  ;;  %v5939_v34 = vpack.c.bf16 %v1227_v32, %v1224_v63  ;;  %v1302_v43 = vsub.f32 %v1210_v60, %v1224_v63  ;;  %v1309_v44 = vsub.f32 %v1211_v61, %v1227_v32  ;;  %v2157_v60 = vld [vmem:[%s7431_s7 + $0x10] sm:$0xff]  ;;  %v2158_v61 = vld [vmem:[%s7431_s7 + $0x18] sm:$0xff] }
  0x40   : > { %5838 = vmatpush3.bf16.msra.mxu0 %v5837_v26  ;;  %v2181_v63 = vand.u32 4294901760, %v2157_v60  ;;  %v2184_v32 = vand.u32 4294901760, %v2158_v61 }
  0x41   : > { %5839 = vmatprep.subr.bf16.mxu0 %v6386_v3  ;;  %v1303_v50 = vand.u32 4294901760, %v1302_v43  ;;  %v1310_v57 = vand.u32 4294901760, %v1309_v44  ;;  %v5945_v5 = vpack.c.bf16 %v1309_v44, %v1302_v43 }
  0x42   : > { %5808 = vmatpush3.bf16.msra.mxu1 %v6842_v47 }
  0x43   : > { %5809 = vmatprep.subr.bf16.mxu1 %v6386_v3  ;;  %v1304_v36 = vsub.f32 %v1302_v43, %v1303_v50  ;;  %v1311_v46 = vsub.f32 %v1309_v44, %v1310_v57  ;;  %v5951_v2 = vpack.c.bf16 %v1310_v57, %v1303_v50  ;;  %v2159_v43 = vld [vmem:[%s7431_s7 + $0x20] sm:$0xff]  ;;  %v2160_v44 = vld [vmem:[%s7431_s7 + $0x28] sm:$0xff] }
  0x44   : > { %5841 = vmatpush3.bf16.msra.mxu0 %v5840_v12  ;;  %v1696_v12 = vand.u32 4294901760, %v1683_v39  ;;  %v2187_v50 = vand.u32 4294901760, %v2159_v43  ;;  %v2190_v57 = vand.u32 4294901760, %v2160_v44 }
  0x45   : > { %5842 = vmatprep.subr.bf16.mxu0 %v6386_v3 }
  0x46   : > { %5811 = vmatpush3.bf16.msra.mxu1 %v6856_v40  ;;  %v1774_v8 = vsub.f32 %v1683_v39, %v1696_v12 }
  0x47   : > { %5190 = vmatmul.mubr.f32.vlgmr.msra.gmra.mrb[0].mxu0 %v6833_v37  ;;  %5812 = vmatprep.subr.bf16.mxu1 %v6386_v3 }
  0x48   : > { %5844 = vmatpush3.bf16.msra.mxu0 %v5843_v38  ;;  %5224 = vmatprep.mubr.msk.f32.mxu0 %vm6387_vm0, %v7484_v51 }
  0x49   : > { %5845 = vmatprep.subr.bf16.mxu0 %v6386_v3 }
  0x4a   : > { %5814 = vmatpush3.bf16.msra.mxu1 %v6868_v48 }
  0x4b   : > { %5815 = vmatprep.subr.bf16.mxu1 %v6386_v3 }
  0x4c   : > { %5847 = vmatpush3.bf16.msra.mxu0 %v5846_v15 }
  0x4d   : > { %5848 = vmatprep.subr.bf16.mxu0 %v6386_v3 }
  0x4e   : > { %5817 = vmatpush3.bf16.msra.mxu1 %v6879_v22 }
  0x4f   : > { %5938 = vmatprep.subr.bf16.mxu1 %v6386_v3 }
  0x50   : > { %5850 = vmatpush3.bf16.msra.mxu0 %v5849_v18 }
  0x51   : > { %5851 = vmatprep.subr.bf16.mxu0 %v6386_v3  ;;  %5155 = vmatmul.mubr.f32.vlgmr.msra.gmra.mrb[0].mxu1 %v653_v49  ;;  %v2155_v49 = vld [vmem:[%s7431_s7] sm:$0xff] }
  0x52   : > { %5336 = vmatprep.mubr.msk.f32.mxu1 %vm6387_vm0, %v7484_v51  ;;  %5940 = vmatpush3.bf16.msra.mxu1 %v5939_v34 }
  0x53   : > { %5941 = vmatprep.subr.bf16.mxu1 %v6386_v3 }
  0x54   : > { %5853 = vmatpush3.bf16.msra.mxu0 %v5852_v53 }
  0x55   : > { %5854 = vmatprep.subr.bf16.mxu0 %v6386_v3 }
  0x58   : > { %5856 = vmatpush3.bf16.msra.mxu0 %v5855_v54  ;;  %v2156_v54 = vld [vmem:[%s7431_s7 + $0x8] sm:$0xff] }
  0x59   : > { %5857 = vmatprep.subr.bf16.mxu0 %v6386_v3 }
  0x5c   : > { %5859 = vmatpush3.bf16.msra.mxu0 %v5858_v27  ;;  %v2175_v27 = vand.u32 4294901760, %v2155_v49 }
  0x5d   : > { %5860 = vmatprep.subr.bf16.mxu0 %v6386_v3 }
  0x60   : > { %5862 = vmatpush3.bf16.msra.mxu0 %v5861_v31  ;;  %v2178_v31 = vand.u32 4294901760, %v2156_v54 }
  0x61   : > { %5863 = vmatprep.subr.bf16.mxu0 %v6386_v3 }
  0x64   : > { %5865 = vmatpush3.bf16.msra.mxu0 %v5864_v55  ;;  %v7019_v55 = vpack.c.bf16 %v2178_v31, %v2175_v27 }
  0x65   : > { %5866 = vmatprep.subr.bf16.mxu0 %v6386_v3 }
  0x67   : > { %5225 = vmatmul.mubr.f32.vlgmr.msra.gmra.mrb[0].mxu0 %v650_v41  ;;  %v4798_v41 = vld [vmem:[%s7494_s4] ss:$0 sm:$0xff]  ;;  %s7382_s4 = scalar_lea.hbm %s7441_s17, %s4807_s29 }
  0x68   : > { %5868 = vmatpush3.bf16.msra.mxu0 %v6764_v10  ;;  %5259 = vmatprep.mubr.msk.f32.mxu0 %vm6387_vm0, %v7484_v51 }
  0x69   : > { %5869 = vmatprep.subr.bf16.mxu0 %v6386_v3 }
  0x6c   : > { %5871 = vmatpush3.bf16.msra.mxu0 %v6775_v0 }
  0x6d   : > { %5872 = vmatprep.subr.bf16.mxu0 %v6386_v3 }
  0x70   : > { %5874 = vmatpush3.bf16.msra.mxu0 %v6817_v52 }
  0x71   : > { %5875 = vmatprep.subr.bf16.mxu0 %v6386_v3 }
  0x74   : > { %5877 = vmatpush3.bf16.msra.mxu0 %v6829_v9 }
  0x75   : > { %5878 = vmatprep.subr.bf16.mxu0 %v6386_v3 }
  0x78   : > { %5880 = vmatpush3.bf16.msra.mxu0 %v6842_v47 }
  0x79   : > { %5881 = vmatprep.subr.bf16.mxu0 %v6386_v3 }
  0x7c   : > { %5883 = vmatpush3.bf16.msra.mxu0 %v6856_v40 }
  0x7d   : > { %5884 = vmatprep.subr.bf16.mxu0 %v6386_v3 }
  0x80   : > { %5886 = vmatpush3.bf16.msra.mxu0 %v6868_v48 }
  0x81   : > { %5887 = vmatprep.subr.bf16.mxu0 %v6386_v3 }
  0x84   : > { %5889 = vmatpush3.bf16.msra.mxu0 %v6879_v22 }
  0x85   : > { %5890 = vmatprep.subr.bf16.mxu0 %v6386_v3 }
  0x87   : > { %5260 = vmatmul.mubr.f32.vlgmr.msra.gmra.mrb[0].mxu0 %v651_v56 }
  0x88   : > { %5892 = vmatpush3.bf16.msra.mxu0 %v6781_v1  ;;  %5294 = vmatprep.mubr.msk.f32.mxu0 %vm6387_vm0, %v7484_v51  ;;  %v1312_v1 = vand.u32 4294901760, %v1311_v46  ;;  %v2161_v46 = vld [vmem:[%s7431_s7 + $0x30] sm:$0xff] }
  0x89   : > { %5893 = vmatprep.subr.bf16.mxu0 %v6386_v3 }
  0x8c   : > { %5895 = vmatpush3.bf16.msra.mxu0 %v6787_v4 }
  0x8d   : > { %5896 = vmatprep.subr.bf16.mxu0 %v6386_v3 }
  0x90   : > { %5898 = vmatpush3.bf16.msra.mxu0 %v6793_v13  ;;  %v4797_v13 = vld [vmem:[%s7492_s2] ss:$0 sm:$0xff]  ;;  %s537_s2 = sand.u32 1, %s6376_s25  }
  0x91   : > { %5899 = vmatprep.subr.bf16.mxu0 %v6386_v3  ;;  %s4795_s22 = sshll.u32 %s537_s2, 3  ;;  %s4719_s18 = scalar_lea.sflag [#allocation3], %s537_s2 }
  0x92   : > { %s539_s30 = scalar_lea.vmem [#allocation2], %s4795_s22  ;;  %s6326_s22 = sshll.u32 %s6389_s28, 4  ;;  %s6327_s22 = int_to_ptr.vmem [resolvable:$false] %s6326_s22 }
  0x93   : > { %s4732_s19 = sshll.u32 %s539_s30, 4  ;;  %s7384_s19 = int_to_ptr.vmem [resolvable:$true] %s4732_s19 }
  0x94   : > { %5901 = vmatpush3.bf16.msra.mxu0 %v6800_v11  ;;  %s6322_s21 = scalar_lea.vmem %s7384_s19, 128  ;;  %p6329_p0 = scmp.lt.s32.totalorder %s7384_s19, %s6327_s22 }
  0x95   : > { %5902 = vmatprep.subr.bf16.mxu0 %v6386_v3  ;;  %p6323_p11 = scmp.ne.s32.totalorder %s7384_s19, %s6322_s21 }
  0x97   : > { %p6324_p12 = pnand %p6323_p11, %p6518_p5 }
  0x98   : > { %5904 = vmatpush3.bf16.msra.mxu0 %v6802_v19 }
  0x99   : > { %5905 = vmatprep.subr.bf16.mxu0 %v6386_v3  ;;  %p6325_p13 = pneg %p6324_p12 }
  0x9c   : > { %5907 = vmatpush3.bf16.msra.mxu0 %v6804_v23 }
  0x9d   : > { %5908 = vmatprep.subr.bf16.mxu0 %v6386_v3 }
  0xa0   : > { %5910 = vmatpush3.bf16.msra.mxu0 %v6806_v24 }
  0xa1   : > { %5911 = vmatprep.subr.bf16.mxu0 %v6386_v3 }
  0xa4   : > { %5913 = vmatpush3.bf16.msra.mxu0 %v6809_v25 }
  0xa5   : > { %5914 = vmatprep.subr.bf16.mxu0 %v6386_v3 }
  0xa7   : > { %5295 = vmatmul.mubr.f32.vlgmr.msra.gmra.mrb[0].mxu0 %v6833_v37 }
  0xa8   : > { %5916 = vmatpush3.bf16.msra.mxu0 %v6764_v10  ;;  %5329 = vmatprep.mubr.msk.f32.mxu0 %vm6387_vm0, %v7484_v51 }
  0xa9   : > { %5917 = vmatprep.subr.bf16.mxu0 %v6386_v3 }
  0xac   : > { %5919 = vmatpush3.bf16.msra.mxu0 %v6775_v0  ;;  %v1305_v0 = vand.u32 4294901760, %v1304_v36  ;;  %v7043_v36 = vpack.c.bf16 %v2190_v57, %v2187_v50 }
  0xad   : > { %5920 = vmatprep.subr.bf16.mxu0 %v6386_v3 }
  0xae   : > { %v5942_v4 = vpack.c.bf16 %v1312_v1, %v1305_v0  ;;  %v2162_v0 = vld [vmem:[%s7431_s7 + $0x38] sm:$0xff]  ;;  %v2193_v1 = vand.u32 4294901760, %v2161_v46 }
  0xb0   : > { %5922 = vmatpush3.bf16.msra.mxu0 %v6817_v52  ;;  %v1684_v52 = vld [vmem:[%s7493_s5 + $0x8] sm:$0xff]  ;;  %s6328_s5 = scalar_lea.vmem %s6327_s22, 256 }
  0xb1   : > { %5923 = vmatprep.subr.bf16.mxu0 %v6386_v3  ;;  %v1699_v29 = vand.u32 4294901760, %v1684_v52  ;;  %p6330_p1 = scmp.lt.s32.totalorder %s6328_s5, %s6322_s21 }
  0xb3   : > { %v5957_v59 = vpack.c.bf16 %v1699_v29, %v1696_v12  ;;  %p6331_p2 = por %p6330_p1, %p6329_p0 }
  0xb4   : > { %5925 = vmatpush3.bf16.msra.mxu0 %v6829_v9  ;;  %v1781_v9 = vsub.f32 %v1684_v52, %v1699_v29 }
  0xb5   : > { %5926 = vmatprep.subr.bf16.mxu0 %v6386_v3  ;;  %p6332_p3 = pnand %p6331_p2, %p6325_p13 }
  0xb6   : > { %v1782_v38 = vand.u32 4294901760, %v1781_v9  ;;  %v5963_v17 = vpack.c.bf16 %v1781_v9, %v1774_v8 }
  0xb8   : > { %5928 = vmatpush3.bf16.msra.mxu0 %v6842_v47  ;;  %v1783_v14 = vsub.f32 %v1781_v9, %v1782_v38 }
  0xb9   : > { %5929 = vmatprep.subr.bf16.mxu0 %v6386_v3 }
  0xba   : > { %v1784_v15 = vand.u32 4294901760, %v1783_v14 }
  0xbc   : > { %5931 = vmatpush3.bf16.msra.mxu0 %v6856_v40 }
  0xbd   : > { %5932 = vmatprep.subr.bf16.mxu0 %v6386_v3 }
  0xc0   : > { %5934 = vmatpush3.bf16.msra.mxu0 %v6868_v48 }
  0xc1   : > { %5935 = vmatprep.subr.bf16.mxu0 %v6386_v3 }
  0xc4   : > { %5937 = vmatpush3.bf16.msra.mxu0 %v6879_v22 }
  0xc5   : > { %6046 = vmatprep.subr.bf16.mxu0 %v6386_v3 }
  0xc7   : > { %5330 = vmatmul.mubr.f32.vlgmr.msra.gmra.mrb[0].mxu0 %v6833_v37  ;;  %v1775_v37 = vand.u32 4294901760, %v1774_v8 }
  0xc8   : > { %5538 = vmatprep.mubr.msk.f32.mxu0 %vm6387_vm0, %v7484_v51 }
  0xc9   : > { %v1776_v42 = vsub.f32 %v1774_v8, %v1775_v37  ;;  %v5969_v40 = vpack.c.bf16 %v1782_v38, %v1775_v37 }
  0xcb   : > { %v1777_v47 = vand.u32 4294901760, %v1776_v42 }
  0xcd   : > { %v5960_v16 = vpack.c.bf16 %v1784_v15, %v1777_v47 }
 0x124   : > { %v655_v10 = vpop.f32.mrb[0].mxu1 }
 0x125   : > { %v5156_v33 = vpop.f32.mrb[1].mxu1  ;;  %v656_v6 = vadd.f32 %v4797_v13, %v655_v10  ;;  %v7039_v10 = vsub.f32 %v2155_v49, %v2175_v27  ;;  %v7055_v13 = vsub.f32 %v2157_v60, %v2181_v63  ;;  %v4799_v27 = vld [vmem:[%s7430_s6] ss:$0 sm:$0xff] }
 0x126   : > { %v7041_v33 = vsub.f32 %v2156_v54, %v2178_v31 }
 0x19a   : > { %v1205_v7 = vpop.f32.mrb[0].mxu0 }
 0x19b   : > { %v6191_v11 = vadd.f32 %v1205_v7, %v656_v6  ;;  %v5331_v19 = vpop.f32.mrb[1].mxu0  ;;  %v7057_v6 = vsub.f32 %v2158_v61, %v2184_v32  ;;  %v7059_v7 = vsub.f32 %v2159_v43, %v2187_v50 }
 0x19d   : > { %v1209_v23 = vmax.f32 %v6191_v11, 0.0  ;;  %v7061_v11 = vsub.f32 %v2160_v44, %v2190_v57  ;;  %v2288_v9 = vand.u32 4294901760, %v7059_v7 }
 0x19f   : > { %v1221_v24 = vsel %vm1219_vm1, %v1209_v23, 0  ;;  %v7065_v23 = vsub.f32 %v2161_v46, %v2193_v1  ;;  %v2295_v37 = vand.u32 4294901760, %v7061_v11  ;;  %v2289_v42 = vsub.f32 %v7059_v7, %v2288_v9  ;;  %v2712_v46 = vld [vmem:[%s7433_s9 + $0x8] sm:$0xff] }
 0x1a0   : > { %v1290_v25 = vand.u32 4294901760, %v1221_v24 }
 0x1a1   : > { %v2296_v14 = vsub.f32 %v7061_v11, %v2295_v37  ;;  %v2290_v47 = vand.u32 4294901760, %v2289_v42  ;;  %v6029_v49 = vpack.c.bf16 %v2295_v37, %v2288_v9 }
 0x1a2   : > { %v1291_v26 = vsub.f32 %v1221_v24, %v1290_v25 }
 0x1a3   : > { %v2297_v15 = vand.u32 4294901760, %v2296_v14 }
 0x1a4   : > { %v1292_v28 = vand.u32 4294901760, %v1291_v26 }
 0x1a6   : > { %v1293_v30 = vsub.f32 %v1291_v26, %v1292_v28 }
 0x1a8   : > { %v1294_v35 = vand.u32 4294901760, %v1293_v30  ;;  %v2274_v30 = vand.u32 4294901760, %v7055_v13 }
 0x1aa   : > { %5337 = vmatmul.mubr.f32.vlgmr.msra.gmra.mrb[2].mxu1 %v1294_v35  ;;  %v2281_v35 = vand.u32 4294901760, %v7057_v6  ;;  %v2275_v52 = vsub.f32 %v7055_v13, %v2274_v30 }
 0x1ab   : > { %5943 = vmatpush3.bf16.msra.mxu1 %v5942_v4  ;;  %5343 = vmatprep.mubr.msk.f32.mxu1 %vm6387_vm0, %v7484_v51  ;;  %v2196_v4 = vand.u32 4294901760, %v2162_v0 }
 0x1ac   : > { %5944 = vmatprep.subr.bf16.mxu1 %v6386_v3  ;;  %v2282_v12 = vsub.f32 %v7057_v6, %v2281_v35 }
 0x1ad   : > { %v7063_v19 = vpack.c.bf16 %v2196_v4, %v2193_v1  ;;  %v7067_v24 = vsub.f32 %v2162_v0, %v2196_v4  ;;  %v2730_v1 = vand.u32 4294901760, %v2712_v46 }
 0x1ae   : > { %v2283_v8 = vand.u32 4294901760, %v2282_v12 }
 0x1b2   : > { %5344 = vmatmul.mubr.f32.vlgmr.msra.gmra.mrb[2].mxu1 %v1290_v25 }
 0x1b3   : > { %5946 = vmatpush3.bf16.msra.mxu1 %v5945_v5  ;;  %5350 = vmatprep.mubr.msk.f32.mxu1 %vm6387_vm0, %v7484_v51  ;;  %v2260_v5 = vand.u32 4294901760, %v7039_v10 }
 0x1b4   : > { %5947 = vmatprep.subr.bf16.mxu1 %v6386_v3 }
 0x1ba   : > { %5351 = vmatmul.mubr.f32.vlgmr.msra.gmra.mrb[2].mxu1 %v1291_v26 }
 0x1bb   : > { %5949 = vmatpush3.bf16.msra.mxu1 %v5939_v34  ;;  %5357 = vmatprep.mubr.msk.f32.mxu1 %vm6387_vm0, %v7484_v51 }
 0x1bc   : > { %5950 = vmatprep.subr.bf16.mxu1 %v6386_v3 }
 0x1c2   : > { %5358 = vmatmul.mubr.f32.vlgmr.msra.gmra.mrb[2].mxu1 %v1292_v28 }
 0x1c3   : > { %5952 = vmatpush3.bf16.msra.mxu1 %v5951_v2  ;;  %5364 = vmatprep.mubr.msk.f32.mxu1 %vm6387_vm0, %v7484_v51  ;;  %v2267_v2 = vand.u32 4294901760, %v7041_v33 }
 0x1c4   : > { %5953 = vmatprep.subr.bf16.mxu1 %v6386_v3 }
 0x1c5   : > { %v2268_v26 = vsub.f32 %v7041_v33, %v2267_v2 }
 0x1c7   : > { %v2269_v39 = vand.u32 4294901760, %v2268_v26 }
 0x1ca   : > { %5365 = vmatmul.mubr.f32.vlgmr.msra.gmra.mrb[2].mxu1 %v1290_v25 }
 0x1cb   : > { %5955 = vmatpush3.bf16.msra.mxu1 %v5939_v34  ;;  %5371 = vmatprep.mubr.msk.f32.mxu1 %vm6387_vm0, %v7484_v51  ;;  %v7029_v34 = vpack.c.bf16 %v2184_v32, %v2181_v63 }
 0x1cc   : > { %5956 = vmatprep.subr.bf16.mxu1 %v6386_v3 }
 0x1d2   : > { %5372 = vmatmul.mubr.f32.vlgmr.msra.gmra.mrb[2].mxu1 %v1290_v25  ;;  %v2261_v25 = vsub.f32 %v7039_v10, %v2260_v5 }
 0x1d3   : > { %5378 = vmatprep.mubr.msk.f32.mxu1 %vm6387_vm0, %v7484_v51  ;;  %5958 = vmatpush3.bf16.msra.mxu1 %v5957_v59 }
 0x1d4   : > { %5959 = vmatprep.subr.bf16.mxu1 %v6386_v3  ;;  %v2262_v28 = vand.u32 4294901760, %v2261_v25 }
 0x1d6   : > { %v5987_v29 = vpack.c.bf16 %v2269_v39, %v2262_v28 }
 0x2a5   : > { %v1678_v56 = vpop.f32.mrb[2].mxu1 }
 0x2a6   : > { %v6192_v18 = vadd.f32 %v4798_v41, %v1678_v56  ;;  %v5373_v20 = vpop.f32.mrb[3].mxu1 }
 0x2a8   : > { %v1682_v45 = vmax.f32 %v6192_v18, 0.0 }
 0x2aa   : > { %v1693_v48 = vsel %vm1219_vm1, %v1682_v45, 0 }
 0x2ab   : > { %v1762_v58 = vand.u32 4294901760, %v1693_v48 }
 0x2ad   : > { %v1763_v53 = vsub.f32 %v1693_v48, %v1762_v58  ;;  %v5999_v48 = vpack.c.bf16 %v7041_v33, %v7039_v10  ;;  %v2711_v33 = vld [vmem:[%s7433_s9] sm:$0xff] }
 0x2ae   : > { %v2727_v0 = vand.u32 4294901760, %v2711_v33 }
 0x2af   : > { %v1764_v62 = vand.u32 4294901760, %v1763_v53 }
 0x2b0   : > { %v7134_v4 = vsub.f32 %v2711_v33, %v2727_v0 }
 0x2b1   : > { %v1765_v21 = vsub.f32 %v1763_v53, %v1764_v62 }
 0x2b3   : > { %v1766_v22 = vand.u32 4294901760, %v1765_v21  ;;  %v6023_v21 = vpack.c.bf16 %v2267_v2, %v2260_v5  ;;  %v7136_v5 = vsub.f32 %v2712_v46, %v2730_v1  ;;  %v2808_v2 = vand.u32 4294901760, %v7134_v4 }
 0x2b5   : > { %5379 = vmatmul.mubr.f32.vlgmr.msra.gmra.mrb[4].mxu1 %v1766_v22  ;;  %v6026_v22 = vpack.c.bf16 %v2281_v35, %v2274_v30 }
 0x2b6   : > { %5961 = vmatpush3.bf16.msra.mxu1 %v5960_v16  ;;  %5385 = vmatprep.mubr.msk.f32.mxu1 %vm6387_vm0, %v7484_v51  ;;  %v2302_v16 = vand.u32 4294901760, %v7065_v23 }
 0x2b7   : > { %5962 = vmatprep.subr.bf16.mxu1 %v6386_v3 }
 0x2b8   : > { %v2303_v41 = vsub.f32 %v7065_v23, %v2302_v16 }
 0x2ba   : > { %v2304_v18 = vand.u32 4294901760, %v2303_v41 }
 0x2bd   : > { %5386 = vmatmul.mubr.f32.vlgmr.msra.gmra.mrb[4].mxu1 %v1762_v58 }
 0x2be   : > { %5964 = vmatpush3.bf16.msra.mxu1 %v5963_v17  ;;  %5392 = vmatprep.mubr.msk.f32.mxu1 %vm6387_vm0, %v7484_v51  ;;  %v2309_v17 = vand.u32 4294901760, %v7067_v24 }
 0x2bf   : > { %5965 = vmatprep.subr.bf16.mxu1 %v6386_v3 }
 0x2c0   : > { %v2310_v56 = vsub.f32 %v7067_v24, %v2309_v17  ;;  %v6032_v54 = vpack.c.bf16 %v2309_v17, %v2302_v16  ;;  %v6059_v16 = vpack.c.bf16 %v7136_v5, %v7134_v4 }
 0x2c2   : > { %v2311_v20 = vand.u32 4294901760, %v2310_v56 }
 0x2c4   : > { %v5996_v45 = vpack.c.bf16 %v2311_v20, %v2304_v18 }
 0x2c5   : > { %5393 = vmatmul.mubr.f32.vlgmr.msra.gmra.mrb[4].mxu1 %v1763_v53  ;;  %v6005_v53 = vpack.c.bf16 %v7061_v11, %v7059_v7 }
 0x2c6   : > { %5967 = vmatpush3.bf16.msra.mxu1 %v5957_v59  ;;  %5399 = vmatprep.mubr.msk.f32.mxu1 %vm6387_vm0, %v7484_v51 }
 0x2c7   : > { %5968 = vmatprep.subr.bf16.mxu1 %v6386_v3 }
 0x2cd   : > { %5400 = vmatmul.mubr.f32.vlgmr.msra.gmra.mrb[4].mxu1 %v1764_v62  ;;  %v6008_v62 = vpack.c.bf16 %v7067_v24, %v7065_v23 }
 0x2ce   : > { %5970 = vmatpush3.bf16.msra.mxu1 %v5969_v40  ;;  %5406 = vmatprep.mubr.msk.f32.mxu1 %vm6387_vm0, %v7484_v51  ;;  %v5993_v40 = vpack.c.bf16 %v2297_v15, %v2290_v47 }
 0x2cf   : > { %5971 = vmatprep.subr.bf16.mxu1 %v6386_v3 }
 0x2d5   : > { %5407 = vmatmul.mubr.f32.vlgmr.msra.gmra.mrb[4].mxu1 %v1762_v58 }
 0x2d6   : > { %5973 = vmatpush3.bf16.msra.mxu1 %v5957_v59  ;;  %5413 = vmatprep.mubr.msk.f32.mxu1 %vm6387_vm0, %v7484_v51  ;;  %v2276_v59 = vand.u32 4294901760, %v2275_v52 }
 0x2d7   : > { %5974 = vmatprep.subr.bf16.mxu1 %v6386_v3 }
 0x2d8   : > { %v5990_v38 = vpack.c.bf16 %v2283_v8, %v2276_v59  ;;  %v6047_v59 = vpack.c.bf16 %v2730_v1, %v2727_v0 }
 0x2da   : > { %6048 = vmatpush3.bf16.msra.mxu0 %v6047_v59 }
 0x2db   : > { %6049 = vmatprep.subr.bf16.mxu0 %v6386_v3 }
 0x2dd   : > { %5414 = vmatmul.mubr.f32.vlgmr.msra.gmra.mrb[4].mxu1 %v1762_v58  ;;  %v6002_v58 = vpack.c.bf16 %v7057_v6, %v7055_v13  ;;  %v2815_v13 = vand.u32 4294901760, %v7136_v5  ;;  %v2809_v6 = vsub.f32 %v7134_v4, %v2808_v2 }
 0x2de   : > { %5432 = vmatprep.mubr.msk.f32.mxu1 %vm6387_vm0, %v7484_v51  ;;  %5976 = vmatpush3.bf16.msra.mxu1 %v7019_v55 }
 0x2df   : > { %5977 = vmatprep.subr.bf16.mxu1 %v6386_v3  ;;  %v2816_v7 = vsub.f32 %v7136_v5, %v2815_v13  ;;  %v6071_v20 = vpack.c.bf16 %v2815_v13, %v2808_v2 }
 0x2e1   : > { %v2817_v11 = vand.u32 4294901760, %v2816_v7 }
 0x2e2   : > { %5979 = vmatpush3.bf16.msra.mxu1 %v7029_v34 }
 0x2e3   : > { %5980 = vmatprep.subr.bf16.mxu1 %v6386_v3 }
 0x2e6   : > { %5982 = vmatpush3.bf16.msra.mxu1 %v7043_v36 }
 0x2e7   : > { %5983 = vmatprep.subr.bf16.mxu1 %v6386_v3 }
 0x2ea   : > { %5985 = vmatpush3.bf16.msra.mxu1 %v7063_v19 }
 0x2eb   : > { %5986 = vmatprep.subr.bf16.mxu1 %v6386_v3 }
 0x3b0   : > { %v2150_v31 = vpop.f32.mrb[4].mxu1 }
 0x3b1   : > { %v6193_v60 = vadd.f32 %v4799_v27, %v2150_v31  ;;  %v5415_v61 = vpop.f32.mrb[5].mxu1  ;;  %v3216_v31 = vld [vmem:[%s7435_s11 + $0x20] sm:$0xff] }
 0x3b2   : > { %v3243_v61 = vand.u32 4294901760, %v3216_v31 }
 0x3b3   : > { %v2154_v63 = vmax.f32 %v6193_v60, 0.0  ;;  %v3217_v60 = vld [vmem:[%s7435_s11 + $0x28] sm:$0xff] }
 0x3b4   : > { %v7246_v5 = vsub.f32 %v3216_v31, %v3243_v61 }
 0x3b5   : > { %v2172_v32 = vsel %vm2170_vm2, %v2154_v63, 0  ;;  %v3246_v63 = vand.u32 4294901760, %v3217_v60 }
 0x3b6   : > { %v7097_v43 = vand.u32 4294901760, %v2172_v32 }
 0x3b7   : > { %v7248_v2 = vsub.f32 %v3217_v60, %v3246_v63 }
 0x3b8   : > { %v2248_v44 = vsub.f32 %v2172_v32, %v7097_v43 }
 0x3ba   : > { %v2249_v50 = vand.u32 4294901760, %v2248_v44 }
 0x3bc   : > { %v2250_v57 = vsub.f32 %v2248_v44, %v2249_v50 }
 0x3be   : > { %v2251_v10 = vand.u32 4294901760, %v2250_v57  ;;  %v3219_v57 = vld [vmem:[%s7435_s11 + $0x38] sm:$0xff] }
 0x3bf   : > { %v3252_v33 = vand.u32 4294901760, %v3219_v57 }
 0x3c0   : > { %5433 = vmatmul.mubr.f32.vlgmr.msra.gmra.mrb[6].mxu1 %v2251_v10 }
 0x3c1   : > { %5988 = vmatpush3.bf16.msra.mxu1 %v5987_v29  ;;  %5451 = vmatprep.mubr.msk.f32.mxu1 %vm6387_vm0, %v7484_v51  ;;  %v7254_v7 = vsub.f32 %v3219_v57, %v3252_v33 }
 0x3c2   : > { %5989 = vmatprep.subr.bf16.mxu1 %v6386_v3 }
 0x3c5   : > { %5991 = vmatpush3.bf16.msra.mxu1 %v5990_v38  ;;  %v4800_v38 = vld [vmem:[%s7432_s8] ss:$0 sm:$0xff] }
 0x3c6   : > { %5992 = vmatprep.subr.bf16.mxu1 %v6386_v3 }
 0x3c9   : > { %5994 = vmatpush3.bf16.msra.mxu1 %v5993_v40 }
 0x3ca   : > { %5995 = vmatprep.subr.bf16.mxu1 %v6386_v3 }
 0x3cd   : > { %5997 = vmatpush3.bf16.msra.mxu1 %v5996_v45  ;;  %v3212_v45 = vld [vmem:[%s7435_s11] sm:$0xff] }
 0x3ce   : > { %5998 = vmatprep.subr.bf16.mxu1 %v6386_v3 }
 0x3d0   : > { %5452 = vmatmul.mubr.f32.vlgmr.msra.gmra.mrb[6].mxu1 %v7097_v43 }
 0x3d1   : > { %6000 = vmatpush3.bf16.msra.mxu1 %v5999_v48  ;;  %5470 = vmatprep.mubr.msk.f32.mxu1 %vm6387_vm0, %v7484_v51  ;;  %v3213_v48 = vld [vmem:[%s7435_s11 + $0x8] sm:$0xff] }
 0x3d2   : > { %6001 = vmatprep.subr.bf16.mxu1 %v6386_v3 }
 0x3d5   : > { %6003 = vmatpush3.bf16.msra.mxu1 %v6002_v58  ;;  %v3231_v58 = vand.u32 4294901760, %v3212_v45 }
 0x3d6   : > { %6004 = vmatprep.subr.bf16.mxu1 %v6386_v3 }
 0x3d7   : > { %v7226_v32 = vsub.f32 %v3212_v45, %v3231_v58 }
 0x3d9   : > { %6006 = vmatpush3.bf16.msra.mxu1 %v6005_v53  ;;  %v3234_v53 = vand.u32 4294901760, %v3213_v48  ;;  %v3316_v46 = vand.u32 4294901760, %v7226_v32 }
 0x3da   : > { %6007 = vmatprep.subr.bf16.mxu1 %v6386_v3 }
 0x3dd   : > { %6009 = vmatpush3.bf16.msra.mxu1 %v6008_v62  ;;  %v7206_v62 = vpack.c.bf16 %v3234_v53, %v3231_v58 }
 0x3de   : > { %6010 = vmatprep.subr.bf16.mxu1 %v6386_v3 }
 0x3e0   : > { %5471 = vmatmul.mubr.f32.vlgmr.msra.gmra.mrb[6].mxu1 %v2248_v44  ;;  %v7230_v44 = vpack.c.bf16 %v3246_v63, %v3243_v61 }
 0x3e1   : > { %6012 = vmatpush3.bf16.msra.mxu1 %v7019_v55  ;;  %5489 = vmatprep.mubr.msk.f32.mxu1 %vm6387_vm0, %v7484_v51 }
 0x3e2   : > { %6013 = vmatprep.subr.bf16.mxu1 %v6386_v3 }
 0x3e5   : > { %6015 = vmatpush3.bf16.msra.mxu1 %v7029_v34 }
 0x3e6   : > { %6016 = vmatprep.subr.bf16.mxu1 %v6386_v3 }
 0x3e9   : > { %6018 = vmatpush3.bf16.msra.mxu1 %v7043_v36 }
 0x3ea   : > { %6019 = vmatprep.subr.bf16.mxu1 %v6386_v3 }
 0x3ed   : > { %6021 = vmatpush3.bf16.msra.mxu1 %v7063_v19 }
 0x3ee   : > { %6022 = vmatprep.subr.bf16.mxu1 %v6386_v3 }
 0x3f0   : > { %5490 = vmatmul.mubr.f32.vlgmr.msra.gmra.mrb[6].mxu1 %v2249_v50  ;;  %v3218_v50 = vld [vmem:[%s7435_s11 + $0x30] sm:$0xff] }
 0x3f1   : > { %6024 = vmatpush3.bf16.msra.mxu1 %v6023_v21  ;;  %5508 = vmatprep.mubr.msk.f32.mxu1 %vm6387_vm0, %v7484_v51  ;;  %v3214_v21 = vld [vmem:[%s7435_s11 + $0x10] sm:$0xff]  ;;  %v3249_v10 = vand.u32 4294901760, %v3218_v50 }
 0x3f2   : > { %6025 = vmatprep.subr.bf16.mxu1 %v6386_v3 }
 0x3f3   : > { %v7250_v13 = vpack.c.bf16 %v3252_v33, %v3249_v10 }
 0x3f5   : > { %6027 = vmatpush3.bf16.msra.mxu1 %v6026_v22  ;;  %v3215_v22 = vld [vmem:[%s7435_s11 + $0x18] sm:$0xff] }
 0x3f6   : > { %6028 = vmatprep.subr.bf16.mxu1 %v6386_v3 }
 0x3f9   : > { %6030 = vmatpush3.bf16.msra.mxu1 %v6029_v49  ;;  %v3237_v49 = vand.u32 4294901760, %v3214_v21 }
 0x3fa   : > { %6031 = vmatprep.subr.bf16.mxu1 %v6386_v3 }
 0x3fb   : > { %v7242_v1 = vsub.f32 %v3214_v21, %v3237_v49  ;;  %v4801_v21 = vld [vmem:[%s7434_s10] ss:$0 sm:$0xff] }
 0x3fd   : > { %6033 = vmatpush3.bf16.msra.mxu1 %v6032_v54  ;;  %v3240_v54 = vand.u32 4294901760, %v3215_v22 }
 0x3fe   : > { %6034 = vmatprep.subr.bf16.mxu1 %v6386_v3 }
 0x3ff   : > { %v7216_v27 = vpack.c.bf16 %v3240_v54, %v3237_v49  ;;  %v7244_v4 = vsub.f32 %v3215_v22, %v3240_v54 }
 0x400   : > { %5509 = vmatmul.mubr.f32.vlgmr.msra.gmra.mrb[6].mxu1 %v7097_v43 }
 0x401   : > { %6036 = vmatpush3.bf16.msra.mxu1 %v7019_v55  ;;  %5527 = vmatprep.mubr.msk.f32.mxu1 %vm6387_vm0, %v7484_v51  ;;  %v2810_v55 = vand.u32 4294901760, %v2809_v6  ;;  %v7252_v6 = vsub.f32 %v3218_v50, %v3249_v10  ;;  %v3769_v10 = vld [vmem:[%s7437_s13 + $0x8] sm:$0xff] }
 0x402   : > { %6037 = vmatprep.subr.bf16.mxu1 %v6386_v3 }
 0x403   : > { %v6053_v23 = vpack.c.bf16 %v2817_v11, %v2810_v55  ;;  %v3317_v55 = vsub.f32 %v7226_v32, %v3316_v46 }
 0x405   : > { %6039 = vmatpush3.bf16.msra.mxu1 %v7029_v34  ;;  %v2713_v34 = vld [vmem:[%s7433_s9 + $0x10] sm:$0xff] }
 0x406   : > { %6040 = vmatprep.subr.bf16.mxu1 %v6386_v3 }
 0x409   : > { %6042 = vmatpush3.bf16.msra.mxu1 %v7043_v36  ;;  %v2714_v36 = vld [vmem:[%s7433_s9 + $0x18] sm:$0xff] }
 0x40a   : > { %6043 = vmatprep.subr.bf16.mxu1 %v6386_v3  ;;  %v2736_v24 = vand.u32 4294901760, %v2714_v36 }
 0x40c   : > { %v2828_v26 = vsub.f32 %v2714_v36, %v2736_v24  ;;  %v3337_v36 = vand.u32 4294901760, %v7244_v4 }
 0x40d   : > { %6045 = vmatpush3.bf16.msra.mxu1 %v7063_v19  ;;  %v2733_v19 = vand.u32 4294901760, %v2713_v34 }
 0x40e   : > { %6052 = vmatprep.subr.bf16.mxu1 %v6386_v3  ;;  %v2829_v30 = vand.u32 4294901760, %v2828_v26 }
 0x40f   : > { %v2821_v25 = vsub.f32 %v2713_v34, %v2733_v19  ;;  %v6050_v9 = vpack.c.bf16 %v2736_v24, %v2733_v19  ;;  %v3330_v34 = vand.u32 4294901760, %v7242_v1 }
 0x410   : > { %5528 = vmatmul.mubr.f32.vlgmr.msra.gmra.mrb[6].mxu1 %v7097_v43  ;;  %v2830_v39 = vsub.f32 %v2828_v26, %v2829_v30  ;;  %v7228_v43 = vsub.f32 %v3213_v48, %v3234_v53 }
 0x411   : > { %6054 = vmatpush3.bf16.msra.mxu1 %v6053_v23  ;;  %5549 = vmatprep.mubr.msk.f32.mxu1 %vm6387_vm0, %v7484_v51  ;;  %v2822_v28 = vand.u32 4294901760, %v2821_v25  ;;  %v6062_v8 = vpack.c.bf16 %v2828_v26, %v2821_v25  ;;  %v3318_v23 = vand.u32 4294901760, %v3317_v55  ;;  %v3331_v24 = vsub.f32 %v7242_v1, %v3330_v34 }
 0x412   : > { %6055 = vmatprep.subr.bf16.mxu1 %v6386_v3  ;;  %v2831_v12 = vand.u32 4294901760, %v2830_v39  ;;  %6051 = vmatpush3.bf16.msra.mxu0 %v6050_v9  ;;  %v3323_v0 = vand.u32 4294901760, %v7228_v43  ;;  %v3351_v39 = vand.u32 4294901760, %v7248_v2 }
 0x413   : > { %v2823_v35 = vsub.f32 %v2821_v25, %v2822_v28  ;;  %6082 = vmatprep.subr.bf16.mxu0 %v6386_v3  ;;  %v6074_v37 = vpack.c.bf16 %v2829_v30, %v2822_v28  ;;  %v3338_v25 = vsub.f32 %v7244_v4, %v3337_v36  ;;  %v3332_v28 = vand.u32 4294901760, %v3331_v24 }
 0x414   : > { %v3324_v11 = vsub.f32 %v7228_v43, %v3323_v0 }
 0x415   : > { %v2824_v52 = vand.u32 4294901760, %v2823_v35  ;;  %v3339_v30 = vand.u32 4294901760, %v3338_v25  ;;  %v3344_v35 = vand.u32 4294901760, %v7246_v5 }
 0x416   : > { %v3325_v19 = vand.u32 4294901760, %v3324_v11 }
 0x417   : > { %v6056_v29 = vpack.c.bf16 %v2831_v12, %v2824_v52  ;;  %v6098_v52 = vpack.c.bf16 %v3339_v30, %v3332_v28  ;;  %v3345_v12 = vsub.f32 %v7246_v5, %v3344_v35  ;;  %v6137_v45 = vpack.c.bf16 %v3351_v39, %v3344_v35 }
 0x418   : > { %v6095_v26 = vpack.c.bf16 %v3325_v19, %v3318_v23  ;;  %v4802_v23 = vld [vmem:[%s7436_s12] ss:$0 sm:$0xff] }
 0x419   : > { %6057 = vmatpush3.bf16.msra.mxu1 %v6056_v29  ;;  %v3352_v29 = vsub.f32 %v7248_v2, %v3351_v39 }
 0x41a   : > { %6058 = vmatprep.subr.bf16.mxu1 %v6386_v3 }
 0x4e3   : > { %v2707_v42 = vpop.f32.mrb[6].mxu1 }
 0x4e4   : > { %v6194_v14 = vadd.f32 %v4800_v38, %v2707_v42  ;;  %v5529_v47 = vpop.f32.mrb[7].mxu1 }
 0x4e6   : > { %v2724_v15 = vsel %vm2722_vm3, %v6194_v14, 0 }
 0x4e7   : > { %v2795_v17 = vand.u32 4294901760, %v2724_v15 }
 0x4e9   : > { %v2796_v40 = vsub.f32 %v2724_v15, %v2795_v17  ;;  %5550 = vmatmul.mubr.f32.vlgmr.msra.gmra.mrb[8].mxu1 %v2795_v17 }
 0x4ea   : > { %6060 = vmatpush3.bf16.msra.mxu1 %v6059_v16  ;;  %5560 = vmatprep.mubr.msk.f32.mxu1 %vm6387_vm0, %v7484_v51 }
 0x4eb   : > { %v2797_v41 = vand.u32 4294901760, %v2796_v40  ;;  %6061 = vmatprep.subr.bf16.mxu1 %v6386_v3 }
 0x4ed   : > { %v2798_v56 = vsub.f32 %v2796_v40, %v2797_v41 }
 0x4ee   : > { %6063 = vmatpush3.bf16.msra.mxu1 %v6062_v8  ;;  %v3353_v8 = vand.u32 4294901760, %v3352_v29 }
 0x4ef   : > { %6064 = vmatprep.subr.bf16.mxu1 %v6386_v3  ;;  %v2799_v18 = vand.u32 4294901760, %v2798_v56  ;;  %v6116_v56 = vpack.c.bf16 %v7254_v7, %v7252_v6 }
 0x4f1   : > { %5539 = vmatmul.mubr.f32.vlgmr.msra.gmra.mrb[2].mxu0 %v2799_v18  ;;  %5561 = vmatmul.mubr.f32.vlgmr.msra.gmra.mrb[8].mxu1 %v2796_v40  ;;  %v6110_v40 = vpack.c.bf16 %v7244_v4, %v7242_v1  ;;  %v6131_v18 = vpack.c.bf16 %v3323_v0, %v3316_v46  ;;  %v3784_v46 = vand.u32 4294901760, %v3769_v10 }
 0x4f2   : > { %6066 = vmatpush3.bf16.msra.mxu1 %v6047_v59  ;;  %5571 = vmatprep.mubr.msk.f32.mxu1 %vm6387_vm0, %v7484_v51 }
 0x4f3   : > { %6067 = vmatprep.subr.bf16.mxu1 %v6386_v3  ;;  %5612 = vmatprep.mubr.msk.f32.mxu0 %vm6387_vm0, %v7484_v51  ;;  %v3866_v1 = vsub.f32 %v3769_v10, %v3784_v46 }
 0x4f4   : > { %6084 = vmatpush3.bf16.msra.mxu0 %v7206_v62 }
 0x4f5   : > { %6085 = vmatprep.subr.bf16.mxu0 %v6386_v3  ;;  %v3867_v4 = vand.u32 4294901760, %v3866_v1 }
 0x4f6   : > { %6069 = vmatpush3.bf16.msra.mxu1 %v6050_v9 }
 0x4f7   : > { %6070 = vmatprep.subr.bf16.mxu1 %v6386_v3 }
 0x4f8   : > { %6087 = vmatpush3.bf16.msra.mxu0 %v7216_v27 }
 0x4f9   : > { %5572 = vmatmul.mubr.f32.vlgmr.msra.gmra.mrb[8].mxu1 %v2797_v41  ;;  %6088 = vmatprep.subr.bf16.mxu0 %v6386_v3  ;;  %v6113_v41 = vpack.c.bf16 %v7248_v2, %v7246_v5  ;;  %v3868_v2 = vsub.f32 %v3866_v1, %v3867_v4 }
 0x4fa   : > { %6072 = vmatpush3.bf16.msra.mxu1 %v6071_v20  ;;  %5582 = vmatprep.mubr.msk.f32.mxu1 %vm6387_vm0, %v7484_v51  ;;  %v6134_v20 = vpack.c.bf16 %v3337_v36, %v3330_v34 }
 0x4fb   : > { %6073 = vmatprep.subr.bf16.mxu1 %v6386_v3 }
 0x4fc   : > { %6090 = vmatpush3.bf16.msra.mxu0 %v7230_v44 }
 0x4fd   : > { %6091 = vmatprep.subr.bf16.mxu0 %v6386_v3 }
 0x4fe   : > { %6075 = vmatpush3.bf16.msra.mxu1 %v6074_v37  ;;  %v3365_v37 = vand.u32 4294901760, %v7254_v7 }
 0x4ff   : > { %6076 = vmatprep.subr.bf16.mxu1 %v6386_v3 }
 0x500   : > { %6093 = vmatpush3.bf16.msra.mxu0 %v7250_v13  ;;  %v3366_v14 = vsub.f32 %v7254_v7, %v3365_v37 }
 0x501   : > { %5583 = vmatmul.mubr.f32.vlgmr.msra.gmra.mrb[8].mxu1 %v2795_v17  ;;  %6094 = vmatprep.subr.bf16.mxu0 %v6386_v3 }
 0x502   : > { %6078 = vmatpush3.bf16.msra.mxu1 %v6047_v59  ;;  %5593 = vmatprep.mubr.msk.f32.mxu1 %vm6387_vm0, %v7484_v51  ;;  %v3346_v59 = vand.u32 4294901760, %v3345_v12  ;;  %v3367_v15 = vand.u32 4294901760, %v3366_v14  ;;  %v4241_v12 = vld [vmem:[%s7439_s15 + $0x8] sm:$0xff] }
 0x503   : > { %6079 = vmatprep.subr.bf16.mxu1 %v6386_v3 }
 0x504   : > { %v6101_v38 = vpack.c.bf16 %v3353_v8, %v3346_v59  ;;  %v4256_v59 = vand.u32 4294901760, %v4241_v12 }
 0x506   : > { %6081 = vmatpush3.bf16.msra.mxu1 %v6050_v9  ;;  %v3358_v9 = vand.u32 4294901760, %v7252_v6 }
 0x507   : > { %6154 = vmatprep.subr.bf16.mxu1 %v6386_v3 }
 0x508   : > { %v3359_v42 = vsub.f32 %v7252_v6, %v3358_v9  ;;  %v6140_v48 = vpack.c.bf16 %v3365_v37, %v3358_v9  ;;  %v3869_v6 = vand.u32 4294901760, %v3868_v2  ;;  %v4338_v37 = vsub.f32 %v4241_v12, %v4256_v59 }
 0x509   : > { %5594 = vmatmul.mubr.f32.vlgmr.msra.gmra.mrb[8].mxu1 %v2795_v17  ;;  %v6107_v17 = vpack.c.bf16 %v7228_v43, %v7226_v32 }
 0x50a   : > { %5714 = vmatprep.mubr.msk.f32.mxu1 %vm6387_vm0, %v7484_v51  ;;  %v3360_v47 = vand.u32 4294901760, %v3359_v42  ;;  %v4339_v42 = vand.u32 4294901760, %v4338_v37 }
 0x50c   : > { %v6104_v16 = vpack.c.bf16 %v3367_v15, %v3360_v47  ;;  %v4340_v47 = vsub.f32 %v4338_v37, %v4339_v42 }
 0x5c4   : > { %v2801_v58 = vpop.f32.mrb[2].mxu0 }
 0x5c5   : > { %v5540_v53 = vpop.f32.mrb[3].mxu0  ;;  %v2802_v22 = vadd.f32 %v4801_v21, %v2801_v58 }
 0x5dc   : > { %v3207_v49 = vpop.f32.mrb[8].mxu1 }
 0x5dd   : > { %v6196_v54 = vadd.f32 %v3207_v49, %v2802_v22  ;;  %v5595_v31 = vpop.f32.mrb[9].mxu1 }
 0x5de   : > { %v4804_v31 = vld [vmem:[%s7440_s16] ss:$0 sm:$0xff] }
 0x5df   : > { %v3211_v60 = vmax.f32 %v6196_v54, 0.0 }
 0x5e1   : > { %v3228_v61 = vsel %vm2170_vm2, %v3211_v60, 0 }
 0x5e2   : > { %v3303_v63 = vand.u32 4294901760, %v3228_v61 }
 0x5e4   : > { %v3304_v32 = vsub.f32 %v3228_v61, %v3303_v63 }
 0x5e6   : > { %v3305_v43 = vand.u32 4294901760, %v3304_v32 }
 0x5e8   : > { %v3306_v50 = vsub.f32 %v3304_v32, %v3305_v43 }
 0x5ea   : > { %v3307_v57 = vand.u32 4294901760, %v3306_v50 }
 0x5ec   : > { %5613 = vmatmul.mubr.f32.vlgmr.msra.gmra.mrb[4].mxu0 %v3307_v57 }
 0x5ed   : > { %6096 = vmatpush3.bf16.msra.mxu0 %v6095_v26  ;;  %5631 = vmatprep.mubr.msk.f32.mxu0 %vm6387_vm0, %v7484_v51 }
 0x5ee   : > { %6097 = vmatprep.subr.bf16.mxu0 %v6386_v3 }
 0x5f1   : > { %6099 = vmatpush3.bf16.msra.mxu0 %v6098_v52  ;;  %v4240_v52 = vld [vmem:[%s7439_s15] sm:$0xff] }
 0x5f2   : > { %6100 = vmatprep.subr.bf16.mxu0 %v6386_v3  ;;  %v4253_v29 = vand.u32 4294901760, %v4240_v52 }
 0x5f4   : > { %v6173_v8 = vpack.c.bf16 %v4256_v59, %v4253_v29  ;;  %v4331_v9 = vsub.f32 %v4240_v52, %v4253_v29 }
 0x5f5   : > { %6102 = vmatpush3.bf16.msra.mxu0 %v6101_v38 }
 0x5f6   : > { %6103 = vmatprep.subr.bf16.mxu0 %v6386_v3  ;;  %v4332_v38 = vand.u32 4294901760, %v4331_v9 }
 0x5f8   : > { %v4333_v14 = vsub.f32 %v4331_v9, %v4332_v38 }
 0x5f9   : > { %6105 = vmatpush3.bf16.msra.mxu0 %v6104_v16  ;;  %v4341_v16 = vand.u32 4294901760, %v4340_v47 }
 0x5fa   : > { %6106 = vmatprep.subr.bf16.mxu0 %v6386_v3  ;;  %v4334_v15 = vand.u32 4294901760, %v4333_v14 }
 0x5fc   : > { %5632 = vmatmul.mubr.f32.vlgmr.msra.gmra.mrb[4].mxu0 %v3303_v63 }
 0x5fd   : > { %6108 = vmatpush3.bf16.msra.mxu0 %v6107_v17  ;;  %5650 = vmatprep.mubr.msk.f32.mxu0 %vm6387_vm0, %v7484_v51  ;;  %v6176_v17 = vpack.c.bf16 %v4341_v16, %v4334_v15 }
 0x5fe   : > { %6109 = vmatprep.subr.bf16.mxu0 %v6386_v3 }
 0x601   : > { %6111 = vmatpush3.bf16.msra.mxu0 %v6110_v40  ;;  %v6179_v40 = vpack.c.bf16 %v4338_v37, %v4331_v9 }
 0x602   : > { %6112 = vmatprep.subr.bf16.mxu0 %v6386_v3 }
 0x605   : > { %6114 = vmatpush3.bf16.msra.mxu0 %v6113_v41  ;;  %v6185_v41 = vpack.c.bf16 %v4339_v42, %v4332_v38 }
 0x606   : > { %6115 = vmatprep.subr.bf16.mxu0 %v6386_v3 }
 0x609   : > { %6117 = vmatpush3.bf16.msra.mxu0 %v6116_v56  ;;  %v4803_v56 = vld [vmem:[%s7438_s14] ss:$0 sm:$0xff] }
 0x60a   : > { %6118 = vmatprep.subr.bf16.mxu0 %v6386_v3 }
 0x60c   : > { %5651 = vmatmul.mubr.f32.vlgmr.msra.gmra.mrb[4].mxu0 %v3304_v32 }
 0x60d   : > { %6120 = vmatpush3.bf16.msra.mxu0 %v7206_v62  ;;  %5669 = vmatprep.mubr.msk.f32.mxu0 %vm6387_vm0, %v7484_v51 }
 0x60e   : > { %6121 = vmatprep.subr.bf16.mxu0 %v6386_v3 }
 0x611   : > { %6123 = vmatpush3.bf16.msra.mxu0 %v7216_v27 }
 0x612   : > { %6124 = vmatprep.subr.bf16.mxu0 %v6386_v3 }
 0x615   : > { %6126 = vmatpush3.bf16.msra.mxu0 %v7230_v44 }
 0x616   : > { %6127 = vmatprep.subr.bf16.mxu0 %v6386_v3 }
 0x619   : > { %6129 = vmatpush3.bf16.msra.mxu0 %v7250_v13 }
 0x61a   : > { %6130 = vmatprep.subr.bf16.mxu0 %v6386_v3 }
 0x61c   : > { %5670 = vmatmul.mubr.f32.vlgmr.msra.gmra.mrb[4].mxu0 %v3305_v43 }
 0x61d   : > { %6132 = vmatpush3.bf16.msra.mxu0 %v6131_v18  ;;  %5688 = vmatprep.mubr.msk.f32.mxu0 %vm6387_vm0, %v7484_v51 }
 0x61e   : > { %6133 = vmatprep.subr.bf16.mxu0 %v6386_v3 }
 0x621   : > { %6135 = vmatpush3.bf16.msra.mxu0 %v6134_v20 }
 0x622   : > { %6136 = vmatprep.subr.bf16.mxu0 %v6386_v3 }
 0x625   : > { %6138 = vmatpush3.bf16.msra.mxu0 %v6137_v45 }
 0x626   : > { %6139 = vmatprep.subr.bf16.mxu0 %v6386_v3 }
 0x629   : > { %6141 = vmatpush3.bf16.msra.mxu0 %v6140_v48 }
 0x62a   : > { %6142 = vmatprep.subr.bf16.mxu0 %v6386_v3 }
 0x62c   : > { %5689 = vmatmul.mubr.f32.vlgmr.msra.gmra.mrb[4].mxu0 %v3303_v63 }
 0x62d   : > { %6144 = vmatpush3.bf16.msra.mxu0 %v7206_v62  ;;  %5707 = vmatprep.mubr.msk.f32.mxu0 %vm6387_vm0, %v7484_v51  ;;  %v3768_v62 = vld [vmem:[%s7437_s13] sm:$0xff] }
 0x62e   : > { %6145 = vmatprep.subr.bf16.mxu0 %v6386_v3  ;;  %v3781_v33 = vand.u32 4294901760, %v3768_v62 }
 0x630   : > { %v3859_v0 = vsub.f32 %v3768_v62, %v3781_v33 }
 0x631   : > { %6147 = vmatpush3.bf16.msra.mxu0 %v7216_v27  ;;  %v6155_v27 = vpack.c.bf16 %v3784_v46, %v3781_v33 }
 0x632   : > { %6148 = vmatprep.subr.bf16.mxu0 %v6386_v3  ;;  %v6161_v55 = vpack.c.bf16 %v3866_v1, %v3859_v0 }
 0x633   : > { %6156 = vmatpush3.bf16.msra.mxu1 %v6155_v27 }
 0x634   : > { %6157 = vmatprep.subr.bf16.mxu1 %v6386_v3 }
 0x635   : > { %6150 = vmatpush3.bf16.msra.mxu0 %v7230_v44  ;;  %v3860_v44 = vand.u32 4294901760, %v3859_v0 }
 0x636   : > { %6151 = vmatprep.subr.bf16.mxu0 %v6386_v3 }
 0x637   : > { %v3861_v5 = vsub.f32 %v3859_v0, %v3860_v44  ;;  %v6167_v11 = vpack.c.bf16 %v3867_v4, %v3860_v44 }
 0x639   : > { %6153 = vmatpush3.bf16.msra.mxu0 %v7250_v13  ;;  %v3862_v13 = vand.u32 4294901760, %v3861_v5 }
 0x63b   : > { %v6158_v7 = vpack.c.bf16 %v3869_v6, %v3862_v13 }
 0x63c   : > { %5708 = vmatmul.mubr.f32.vlgmr.msra.gmra.mrb[4].mxu0 %v3303_v63 }
 0x70f   : > { %v3763_v34 = vpop.f32.mrb[4].mxu0 }
 0x710   : > { %v6197_v36 = vadd.f32 %v4802_v23, %v3763_v34  ;;  %v5709_v19 = vpop.f32.mrb[5].mxu0 }
 0x712   : > { %v3767_v24 = vmax.f32 %v6197_v36, 0.0 }
 0x714   : > { %v3778_v25 = vsel %vm1219_vm1, %v3767_v24, 0 }
 0x715   : > { %v3847_v26 = vand.u32 4294901760, %v3778_v25 }
 0x717   : > { %v3848_v28 = vsub.f32 %v3778_v25, %v3847_v26 }
 0x719   : > { %v3849_v30 = vand.u32 4294901760, %v3848_v28 }
 0x71b   : > { %v3850_v35 = vsub.f32 %v3848_v28, %v3849_v30 }
 0x71d   : > { %v3851_v39 = vand.u32 4294901760, %v3850_v35 }
 0x71f   : > { %5715 = vmatmul.mubr.f32.vlgmr.msra.gmra.mrb[10].mxu1 %v3851_v39 }
 0x720   : > { %6159 = vmatpush3.bf16.msra.mxu1 %v6158_v7  ;;  %5721 = vmatprep.mubr.msk.f32.mxu1 %vm6387_vm0, %v7484_v51 }
 0x721   : > { %6160 = vmatprep.subr.bf16.mxu1 %v6386_v3 }
 0x727   : > { %5722 = vmatmul.mubr.f32.vlgmr.msra.gmra.mrb[10].mxu1 %v3847_v26 }
 0x728   : > { %6162 = vmatpush3.bf16.msra.mxu1 %v6161_v55  ;;  %5728 = vmatprep.mubr.msk.f32.mxu1 %vm6387_vm0, %v7484_v51 }
 0x729   : > { %6163 = vmatprep.subr.bf16.mxu1 %v6386_v3 }
 0x72f   : > { %5729 = vmatmul.mubr.f32.vlgmr.msra.gmra.mrb[10].mxu1 %v3848_v28 }
 0x730   : > { %6165 = vmatpush3.bf16.msra.mxu1 %v6155_v27  ;;  %5735 = vmatprep.mubr.msk.f32.mxu1 %vm6387_vm0, %v7484_v51 }
 0x731   : > { %6166 = vmatprep.subr.bf16.mxu1 %v6386_v3 }
 0x737   : > { %5736 = vmatmul.mubr.f32.vlgmr.msra.gmra.mrb[10].mxu1 %v3849_v30 }
 0x738   : > { %6168 = vmatpush3.bf16.msra.mxu1 %v6167_v11  ;;  %5742 = vmatprep.mubr.msk.f32.mxu1 %vm6387_vm0, %v7484_v51 }
 0x739   : > { %6169 = vmatprep.subr.bf16.mxu1 %v6386_v3 }
 0x73f   : > { %5743 = vmatmul.mubr.f32.vlgmr.msra.gmra.mrb[10].mxu1 %v3847_v26 }
 0x740   : > { %6171 = vmatpush3.bf16.msra.mxu1 %v6155_v27  ;;  %5749 = vmatprep.mubr.msk.f32.mxu1 %vm6387_vm0, %v7484_v51 }
 0x741   : > { %6172 = vmatprep.subr.bf16.mxu1 %v6386_v3 }
 0x747   : > { %5750 = vmatmul.mubr.f32.vlgmr.msra.gmra.mrb[10].mxu1 %v3847_v26 }
 0x748   : > { %5756 = vmatprep.mubr.msk.f32.mxu1 %vm6387_vm0, %v7484_v51  ;;  %6174 = vmatpush3.bf16.msra.mxu1 %v6173_v8 }
 0x749   : > { %6175 = vmatprep.subr.bf16.mxu1 %v6386_v3 }
 0x81a   : > { %v4235_v18 = vpop.f32.mrb[10].mxu1 }
 0x81b   : > { %v6198_v20 = vadd.f32 %v4803_v56, %v4235_v18  ;;  %v5751_v45 = vpop.f32.mrb[11].mxu1 }
 0x81d   : > { %v4239_v48 = vmax.f32 %v6198_v20, 0.0 }
 0x81f   : > { %v4250_v58 = vsel %vm1219_vm1, %v4239_v48, 0 }
 0x820   : > { %v4319_v53 = vand.u32 4294901760, %v4250_v58 }
 0x822   : > { %v4320_v21 = vsub.f32 %v4250_v58, %v4319_v53 }
 0x824   : > { %v4321_v22 = vand.u32 4294901760, %v4320_v21 }
 0x826   : > { %v4322_v49 = vsub.f32 %v4320_v21, %v4321_v22 }
 0x828   : > { %v4323_v54 = vand.u32 4294901760, %v4322_v49 }
 0x82a   : > { %5757 = vmatmul.mubr.f32.vlgmr.msra.gmra.mrb[12].mxu1 %v4323_v54 }
 0x82b   : > { %6177 = vmatpush3.bf16.msra.mxu1 %v6176_v17  ;;  %5763 = vmatprep.mubr.msk.f32.mxu1 %vm6387_vm0, %v7484_v51 }
 0x82c   : > { %6178 = vmatprep.subr.bf16.mxu1 %v6386_v3 }
 0x832   : > { %5764 = vmatmul.mubr.f32.vlgmr.msra.gmra.mrb[12].mxu1 %v4319_v53 }
 0x833   : > { %6180 = vmatpush3.bf16.msra.mxu1 %v6179_v40  ;;  %5770 = vmatprep.mubr.msk.f32.mxu1 %vm6387_vm0, %v7484_v51 }
 0x834   : > { %6181 = vmatprep.subr.bf16.mxu1 %v6386_v3 }
 0x83a   : > { %5771 = vmatmul.mubr.f32.vlgmr.msra.gmra.mrb[12].mxu1 %v4320_v21 }
 0x83b   : > { %6183 = vmatpush3.bf16.msra.mxu1 %v6173_v8  ;;  %5777 = vmatprep.mubr.msk.f32.mxu1 %vm6387_vm0, %v7484_v51 }
 0x83c   : > { %6184 = vmatprep.subr.bf16.mxu1 %v6386_v3 }
 0x842   : > { %5778 = vmatmul.mubr.f32.vlgmr.msra.gmra.mrb[12].mxu1 %v4321_v22 }
 0x843   : > { %6186 = vmatpush3.bf16.msra.mxu1 %v6185_v41  ;;  %5784 = vmatprep.mubr.msk.f32.mxu1 %vm6387_vm0, %v7484_v51 }
 0x844   : > { %6187 = vmatprep.subr.bf16.mxu1 %v6386_v3 }
 0x84a   : > { %5785 = vmatmul.mubr.f32.vlgmr.msra.gmra.mrb[12].mxu1 %v4319_v53 }
 0x84b   : > { %6189 = vmatpush3.bf16.msra.mxu1 %v6173_v8  ;;  %5791 = vmatprep.mubr.msk.f32.mxu1 %vm6387_vm0, %v7484_v51 }
 0x852   : > { %5792 = vmatmul.mubr.f32.vlgmr.msra.gmra.mrb[12].mxu1 %v4319_v53 }
 0x925   : > { %v4707_v60 = vpop.f32.mrb[12].mxu1 }
 0x926   : > { %v6199_v61 = vadd.f32 %v4804_v31, %v4707_v60  ;;  %v5793_v63 = vpop.f32.mrb[13].mxu1 }
 0x928   : > { %v4805_v32 = vmul.f32 -1.442695, %v6199_v61 }
 0x92a   : > { %6318 = vpow2.f32 %v4805_v32 }
 0x934   : > { %v6319_v43 = vpop.eup %6318 }
 0x935   : > { %v4714_v3 = vadd.f32 1.0, %v6319_v43 }
 0x937   : > { %6320 = vrcp.f32 %v4714_v3 }
 0x941   : > { %v6321_v51 = vpop.eup %6320 }
 0x942   : > { %4717 = vst [vmem:[%s539_s30] sm:$0xff] %v6321_v51 }
 0x943   : > { %6335 = shalt.err (!%p6332_p3)
}
 0x944   : > { %s6336_s3 = scalar_lea.hbm %s7382_s4, 128  ;;  %s6340_s30 = scalar_lea.hbm %s7441_s17, 256 }
 0x945   : > { %p6337_p4 = scmp.ne.s32.totalorder %s7382_s4, %s6336_s3  ;;  %p6341_p9 = scmp.lt.u32.totalorder %s7382_s4, %s7441_s17 }
 0x946   : > { %p6342_p10 = scmp.lt.u32.totalorder %s6340_s30, %s6336_s3  ;;  %p6344_p12 = scmp.lt.u32.totalorder %s6336_s3, %s7382_s4 }
 0x947   : > { %p6338_p7 = pnand %p6337_p4, %p6518_p5 }
 0x948   : > { %p6343_p11 = por %p6342_p10, %p6341_p9 }
 0x949   : > { %p6339_p8 = pneg %p6338_p7 }
 0x94a   : > { %p6345_p13 = por %p6344_p12, %p6343_p11 }
 0x94c   : > { %p6346_p0 = pnand %p6345_p13, %p6339_p8 }
 0x94e   : > { %6349 = shalt.err (!%p6346_p0)
}
 0x94f   : > { %6276 = dma.vmem_to_hbm [thread:$0]  (%p6518_p5), %s7384_s19, 128, %s7382_s4, %s4719_s18  }
 0x950 PF: > { %p6282_p1 = scmp.ge.s32.totalorder %s6384_s27, 2  ;;  %s4744_s5 = sand.u32 1, %s6372_s24  }
 0x951   : > { %s4745_s21 = scalar_lea.sflag [#allocation3], %s4744_s5 }
 0x952   : > { %p6279_p2 = pnand %p6282_p1, %p6522_p6 }
 0x954   : > { %6367 = dma.done.wait (!%p6279_p2), %s4745_s21, 128  }
 0x955   : > { %6369 = vsyncadd (!%p6279_p2), %s4745_s21, 4294967168  ;;  %s7495_s22 = sld [smem:[#allocation5_spill]]  ;;  %s7496_s26 = sld [smem:[#allocation6_spill]] }
 0x956   : > { %p27_p3 = scmp.ge.s32.totalorder %s6505_s0, 4   ;;  %s7497_s24 = smov %s6376_s25 }
 0x957   : > { %s7499_s27 = smov %s6505_s0 }
 0x958   :  { %29 = sbr.rel (!%p27_p3) target bundleno = 10 (0xa), region = 123 }
 0x95b   : > { %s7498_s25 = smov %s7495_s22 }
 0x95f   :  { %4750 = vsyncpa [#allocation3], 1 }
 0x960   :  { %4752 = vsyncpa [#allocation3 + $0x1], 1 }

</bundles_post_ra>
